<compile_context>
chip_gen: v5e
topology: v5e:2x2
jax: 0.10.0
libtpu: 0.0.40
codegen_flags: <defaults>
</compile_context>

<pallas_src>
from functools import partial

import jax
import jax.numpy as jnp
from jax.experimental import pallas as pl
from jax.experimental.pallas import tpu as pltpu


def _round_up(v, m):
    return (v + m - 1) // m * m


def _gru_kernel(gi_ref, whh_hbm, bhhn_ref, h0_ref, out_ref, hT_ref, whh_vmem,
                *, seq_len):
    # gi_ref:   (t_chunk, Bp, 3*Hp) f32  precomputed input projection (streamed)
    # whh_hbm:  (Hp, 3*Hp) bf16          hidden weights, raw HBM ref (copied once)
    # bhhn_ref: (1, Hp) f32              b_hh of the n gate (applied inside r*(...))
    # h0_ref:   (Bp, Hp) f32
    # out_ref:  (Bp, Hp) = relu(h_T);  hT_ref: (Bp, Hp) = h_T (resident across grid)
    # whh_vmem: (Hp, 3*Hp) bf16 scratch, persists across grid steps
    t = pl.program_id(0)
    Tc, Bp, G3 = gi_ref.shape
    Hp = G3 // 3

    @pl.when(t == 0)
    def _():
        # One-time residency copy: W_hh stays single-buffered in VMEM for the whole
        # grid instead of being double-buffered by a constant-index BlockSpec.
        pltpu.sync_copy(whh_hbm, whh_vmem)
        hT_ref[...] = h0_ref[...]

    # Hoisted once per chunk (JAX does not CSE broadcast_in_dim inside the loop).
    whh = whh_vmem[...]                                    # (Hp, 3*Hp) bf16
    bhh_n = jnp.broadcast_to(bhhn_ref[...], (Bp, Hp))      # (Bp, Hp) f32

    base = t * Tc                       # global timestep of this chunk's first row
    ragged = (seq_len % Tc) != 0        # trace-time constant

    def step(j, h):
        gi = gi_ref[j]                                     # (Bp, 3*Hp) f32, lane-dense
        # bf16 MXU matmul, f32 accumulation; h itself is carried in f32.
        gh = jnp.dot(h.astype(jnp.bfloat16), whh,
                     preferred_element_type=jnp.float32)   # (Bp, 3*Hp)
        # PyTorch gate order (r, z, n); 128-lane-aligned gate blocks, fused r/z sigmoid.
        rz = jax.nn.sigmoid(gi[:, :2 * Hp] + gh[:, :2 * Hp])
        r = rz[:, :Hp]
        z = rz[:, Hp:]
        n = jnp.tanh(gi[:, 2 * Hp:] + r * (gh[:, 2 * Hp:] + bhh_n))
        h_new = (1.0 - z) * n + z * h
        if ragged:
            # Discard updates for zero-padded timesteps of the last (ragged) chunk.
            h_new = jnp.where(base + j < seq_len, h_new, h)
        return h_new

    h = jax.lax.fori_loop(0, Tc, step, hT_ref[...], unroll=min(Tc, 8))
    hT_ref[...] = h

    @pl.when(t == pl.num_programs(0) - 1)
    def _():
        out_ref[...] = jnp.maximum(h, 0.0)   # relu(out[:, -1]) == relu(h_T) for 1 layer


def gru_net_forward(x, h0, w_ih, w_hh, b_ih, b_hh, *, t_chunk=None):
    """x: (B, T, D) batch-first; h0: (1, B, H).
    w_ih: (3H, D), w_hh: (3H, H), b_ih/b_hh: (3H,)  — PyTorch parameter layouts.
    Returns (relu(out[:, -1]), h_T) with shapes (B, H) and (1, B, H)."""
    B, T, D = x.shape
    H = h0.shape[-1]
    f32 = jnp.float32
    bf16 = jnp.bfloat16

    Hp = _round_up(H, 128)     # lane-aligned gate blocks
    Bp = _round_up(B, 8)       # sublane-aligned batch

    # t_chunk sizing: amortize ~0.35 us/grid-step overhead with big chunks, capped so
    # the double-buffered gi stream stays within a modest VMEM budget (v7x: 64 MiB).
    gi_step_bytes = Bp * 3 * Hp * 4
    if t_chunk is None:
        t_chunk = max(1, min(T, 64, (8 << 20) // (2 * gi_step_bytes)))
    t_chunk = max(1, min(t_chunk, T))
    n_chunks = (T + t_chunk - 1) // t_chunk
    T_pad = n_chunks * t_chunk          # ragged tail handled in-kernel, no T%chunk req.

    w_ih = w_ih.astype(f32)
    w_hh = w_hh.astype(f32)
    b_ih = b_ih.astype(f32)
    b_hh = b_hh.astype(f32)

    # Per-gate (r, z, n) blocks of W^T, each padded to Hp lanes -> (in_dim, 3*Hp).
    def gate_blocks(w, rows_pad):
        blocks = []
        for g in range(3):
            wt = w[g * H:(g + 1) * H, :].T                       # (in_dim, H)
            wt = jnp.pad(wt, ((0, rows_pad - wt.shape[0]), (0, Hp - H)))
            blocks.append(wt)
        return jnp.concatenate(blocks, axis=1)                   # (rows_pad, 3*Hp)

    wih_p = gate_blocks(w_ih, D)                                 # f32, used outside only
    whh_p = gate_blocks(w_hh, Hp).astype(bf16)                   # (Hp, 3*Hp) bf16 MXU op

    def pad_h(v):
        return jnp.pad(v, (0, Hp - H))

    # Fold b_hh of r/z gates into the input-side bias (exact: plain adds); keep b_hn
    # separate because PyTorch applies it inside r * (W_hn h + b_hn).
    bih_p = jnp.concatenate([
        pad_h(b_ih[0:H] + b_hh[0:H]),
        pad_h(b_ih[H:2 * H] + b_hh[H:2 * H]),
        pad_h(b_ih[2 * H:3 * H]),
    ]).reshape(1, 1, 3 * Hp)
    bhhn_p = pad_h(b_hh[2 * H:3 * H]).reshape(1, Hp)

    # Input projection precomputed as one large XLA matmul; time-major 3-D gi stream
    # (no 2-D flatten of x).  Zero padding of batch/time rows is benign (masked /
    # sliced off).
    gi = jnp.einsum('btd,dg->tbg', x.astype(f32), wih_p) + bih_p   # (T, B, 3*Hp)
    gi = jnp.pad(gi, ((0, T_pad - T), (0, Bp - B), (0, 0)))        # (T_pad, Bp, 3*Hp)

    h0_p = jnp.pad(h0[0].astype(f32), ((0, Bp - B), (0, Hp - H)))  # (Bp, Hp)

    # VMEM footprint: double-buffered gi stream + single-buffered W_hh + small blocks.
    vmem_bytes = (2 * t_chunk * gi_step_bytes        # gi double buffer
                  + Hp * 3 * Hp * 2                  # whh scratch (bf16)
                  + 8 * Bp * Hp * 4 + 4 * Hp * 4)    # h0/out/hT buffers, biases
    vmem_limit = int(min(64 << 20, max(16 << 20, 2 * vmem_bytes)))

    grid_spec = pltpu.PrefetchScalarGridSpec(
        num_scalar_prefetch=0,
        grid=(n_chunks,),
        in_specs=[
            pl.BlockSpec((t_chunk, Bp, 3 * Hp), lambda t: (t, 0, 0)),  # streamed gi
            pl.BlockSpec(memory_space=pl.ANY),                         # W_hh raw HBM
            pl.BlockSpec((1, Hp), lambda t: (0, 0)),                   # b_hn
            pl.BlockSpec((Bp, Hp), lambda t: (0, 0)),                  # h0
        ],
        out_specs=(
            pl.BlockSpec((Bp, Hp), lambda t: (0, 0)),                  # relu(h_T)
            pl.BlockSpec((Bp, Hp), lambda t: (0, 0)),                  # h_T (resident)
        ),
        scratch_shapes=[pltpu.VMEM((Hp, 3 * Hp), bf16)],               # resident W_hh
    )

    out_p, hT_p = pl.pallas_call(
        partial(_gru_kernel, seq_len=T),
        out_shape=(jax.ShapeDtypeStruct((Bp, Hp), f32),
                   jax.ShapeDtypeStruct((Bp, Hp), f32)),
        grid_spec=grid_spec,
        compiler_params=pltpu.CompilerParams(
            dimension_semantics=("arbitrary",),
            vmem_limit_bytes=vmem_limit,
        ),
    )(gi, whh_p, bhhn_p, h0_p)

    out = out_p[:B, :H]
    h_T = hT_p[:B, :H][None]
    return out, h_T


def _gru_reference(x, h0, w_ih, w_hh, b_ih, b_hh, emulate_bf16_hidden=False):
    """Pure-JAX reference with PyTorch GRU semantics.  With emulate_bf16_hidden=True
    it mirrors the kernel's bf16 MXU operands for the hidden matmul (tight check)."""
    H = h0.shape[-1]
    f32 = jnp.float32
    w_hh_m = (w_hh.astype(jnp.bfloat16).astype(f32)
              if emulate_bf16_hidden else w_hh)
    h = h0[0]
    for t in range(x.shape[1]):
        xt = x[:, t]
        gi = xt @ w_ih.T + b_ih
        h_in = h.astype(jnp.bfloat16).astype(f32) if emulate_bf16_hidden else h
        gh = h_in @ w_hh_m.T + b_hh
        r = jax.nn.sigmoid(gi[:, :H] + gh[:, :H])
        z = jax.nn.sigmoid(gi[:, H:2 * H] + gh[:, H:2 * H])
        n = jnp.tanh(gi[:, 2 * H:] + r * gh[:, 2 * H:])
        h = (1.0 - z) * n + z * h
    return jnp.maximum(h, 0.0), h[None]


if __name__ == "__main__":
    # Small, module-consistent shapes: batch=2, seq=8, input_dim=16, hidden_dim=32,
    # n_layers=1 (dropout has no effect for a single-layer GRU).
    B, T, D, H = 2, 8, 16, 32

    key = jax.random.PRNGKey(0)
    kx, kx2, kh, k1, k2, k3, k4 = jax.random.split(key, 7)

    # Deterministic parameter init, PyTorch-style uniform(-1/sqrt(H), 1/sqrt(H)).
    bound = 1.0 / jnp.sqrt(jnp.float32(H))
    w_ih = jax.random.uniform(k1, (3 * H, D), jnp.float32, -bound, bound)
    w_hh = jax.random.uniform(k2, (3 * H, H), jnp.float32, -bound, bound)
    b_ih = jax.random.uniform(k3, (3 * H,), jnp.float32, -bound, bound)
    b_hh = jax.random.uniform(k4, (3 * H,), jnp.float32, -bound, bound)

    def run_case(x, h0, t_chunk=None):
        out, h_T = gru_net_forward(x, h0, w_ih, w_hh, b_ih, b_hh, t_chunk=t_chunk)
        out = jax.block_until_ready(out)
        h_T = jax.block_until_ready(h_T)
        assert out.shape == (x.shape[0], H) and h_T.shape == (1, x.shape[0], H)
        # Tight check vs a reference that mirrors the kernel's bf16 hidden-matmul ops.
        o_bf, h_bf = _gru_reference(x, h0, w_ih, w_hh, b_ih, b_hh,
                                    emulate_bf16_hidden=True)
        assert jnp.allclose(out, o_bf, atol=1e-3, rtol=1e-3)
        assert jnp.allclose(h_T, h_bf, atol=1e-3, rtol=1e-3)
        # Looser check vs the pure-f32 PyTorch-semantics reference (bf16 MXU operands).
        o_f, h_f = _gru_reference(x, h0, w_ih, w_hh, b_ih, b_hh)
        assert jnp.allclose(out, o_f, atol=2e-2, rtol=2e-2)
        assert jnp.allclose(h_T, h_f, atol=2e-2, rtol=2e-2)

    # Case 1: zero initial hidden (GRUNet.init_hidden), default chunking (T fits in
    # one chunk -> single grid step).
    x = jax.random.normal(kx, (B, T, D), jnp.float32)
    h0 = jnp.zeros((1, B, H), jnp.float32)
    run_case(x, h0)

    # Case 2: nonzero initial hidden, ragged multi-chunk grid (T=8, t_chunk=3).
    h0b = 0.1 * jax.random.normal(kh, (1, B, H), jnp.float32)
    run_case(x, h0b, t_chunk=3)

    # Case 3: prime-length sequence (previously the worst case), ragged tail.
    x2 = jax.random.normal(kx2, (B, 19, D), jnp.float32)
    run_case(x2, h0b, t_chunk=8)

    print("KERNEL_OK")
</pallas_src>

<mosaic_0001>
module attributes {stable_mosaic.version = 11 : i64} {
  func.func @_gru_kernel(%arg0: i32, %arg1: memref<8x8x384xf32, #tpu.memory_space<vmem>>, %arg2: memref<128x384xbf16, #tpu.memory_space<any>>, %arg3: memref<1x128xf32, #tpu.memory_space<vmem>>, %arg4: memref<8x128xf32, #tpu.memory_space<vmem>>, %arg5: memref<8x128xf32, #tpu.memory_space<vmem>>, %arg6: memref<8x128xf32, #tpu.memory_space<vmem>>, %arg7: memref<128x384xbf16, #tpu.memory_space<vmem>>) attributes {dimension_semantics = [#tpu.dimension_semantics<arbitrary>], iteration_bounds = array<i64: 1>, scalar_prefetch = 0 : i64, scratch_operands = 1 : i64, tpu.core_type = #tpu.core_type<tc>, window_params = [{transform_indices = @transform_0, window_bounds = array<i64: 8, 8, 384>}, {}, {pipeline_mode = #tpu.pipeline_mode<synchronous>, transform_indices = @transform_2, window_bounds = array<i64: 1, 128>}, {pipeline_mode = #tpu.pipeline_mode<synchronous>, transform_indices = @transform_3, window_bounds = array<i64: 8, 128>}, {pipeline_mode = #tpu.pipeline_mode<synchronous>, transform_indices = @transform_4, window_bounds = array<i64: 8, 128>}, {pipeline_mode = #tpu.pipeline_mode<synchronous>, transform_indices = @transform_5, window_bounds = array<i64: 8, 128>}]} {
    %c0_i32 = arith.constant 0 : i32
    %0 = arith.cmpi eq, %arg0, %c0_i32 : i32
    %1 = arith.extui %0 : i1 to i32
    %c0_i32_0 = arith.constant 0 : i32
    %2 = arith.cmpi ne, %1, %c0_i32_0 : i32
    scf.if %2 {
      "tpu.region"() ({
        %222 = tpu.sem_alloc : memref<!tpu.dma_semaphore, #tpu.memory_space<semaphore_mem>>
        tpu.enqueue_dma source(%arg2 : memref<128x384xbf16, #tpu.memory_space<any>>) target(%arg7 : memref<128x384xbf16, #tpu.memory_space<vmem>>) target_semaphore(%222 : memref<!tpu.dma_semaphore, #tpu.memory_space<semaphore_mem>>)
        tpu.wait_dma2 semaphore(%222 : memref<!tpu.dma_semaphore, #tpu.memory_space<semaphore_mem>>) src(%arg2 : memref<128x384xbf16, #tpu.memory_space<any>>) dst(%arg7 : memref<128x384xbf16, #tpu.memory_space<vmem>>)
        tpu.yield
      }) : () -> ()
      %c0_50 = arith.constant 0 : index
      %c0_51 = arith.constant 0 : index
      %220 = vector.load %arg4[%c0_50, %c0_51] : memref<8x128xf32, #tpu.memory_space<vmem>>, vector<8x128xf32>
      %c0_52 = arith.constant 0 : index
      %c0_53 = arith.constant 0 : index
      %221 = vector.load %arg6[%c0_52, %c0_53] : memref<8x128xf32, #tpu.memory_space<vmem>>, vector<8x128xf32>
      tpu.vector_store %arg6[%c0_52, %c0_53], %220 {strides = array<i32>} : memref<8x128xf32, #tpu.memory_space<vmem>>, vector<8x128xf32>,
    } else {
    }
    %c0 = arith.constant 0 : index
    %c0_1 = arith.constant 0 : index
    %3 = vector.load %arg7[%c0, %c0_1] : memref<128x384xbf16, #tpu.memory_space<vmem>>, vector<128x384xbf16>
    %c0_2 = arith.constant 0 : index
    %c0_3 = arith.constant 0 : index
    %4 = vector.load %arg3[%c0_2, %c0_3] : memref<1x128xf32, #tpu.memory_space<vmem>>, vector<1x128xf32>
    %5 = vector.shape_cast %4 : vector<1x128xf32> to vector<1x128xf32>
    %6 = vector.broadcast %5 : vector<1x128xf32> to vector<8x128xf32>
    %c0_4 = arith.constant 0 : index
    %c0_5 = arith.constant 0 : index
    %7 = vector.load %arg6[%c0_4, %c0_5] : memref<8x128xf32, #tpu.memory_space<vmem>>, vector<8x128xf32>
    %c0_i32_6 = arith.constant 0 : i32
    %8 = arith.index_cast %c0_i32_6 : i32 to index
    %c0_7 = arith.constant 0 : index
    %c0_8 = arith.constant 0 : index
    %9 = vector.load %arg1[%8, %c0_7, %c0_8] : memref<8x8x384xf32, #tpu.memory_space<vmem>>, vector<1x8x384xf32>
    %10 = vector.shape_cast %9 : vector<1x8x384xf32> to vector<8x384xf32>
    %11 = arith.truncf %7 : vector<8x128xf32> to vector<8x128xbf16>
    %cst = arith.constant dense<0.000000e+00> : vector<8x384xf32>
    %12 = tpu.matmul %11, %3, %cst {dimension_numbers = #tpu.dot_dimension_numbers<[1], [0], [0], [1], [0, 0, 1, 1], [], []>} : vector<8x128xbf16>, vector<128x384xbf16>, vector<8x384xf32> -> vector<8x384xf32>
    %13 = vector.extract_strided_slice %10 {offsets = [0, 0], sizes = [8, 256], strides = [1, 1]} : vector<8x384xf32> to vector<8x256xf32>
    %14 = vector.extract_strided_slice %12 {offsets = [0, 0], sizes = [8, 256], strides = [1, 1]} : vector<8x384xf32> to vector<8x256xf32>
    %15 = arith.addf %13, %14 : vector<8x256xf32>
    %16 = arith.negf %15 : vector<8x256xf32>
    %17 = math.exp %16 : vector<8x256xf32>
    %cst_9 = arith.constant 1.000000e+00 : f32
    %18 = vector.broadcast %cst_9 : f32 to vector<8x256xf32>
    %19 = arith.addf %18, %17 : vector<8x256xf32>
    %20 = arith.divf %18, %19 : vector<8x256xf32>
    %21 = vector.extract_strided_slice %20 {offsets = [0, 0], sizes = [8, 128], strides = [1, 1]} : vector<8x256xf32> to vector<8x128xf32>
    %22 = vector.extract_strided_slice %20 {offsets = [0, 128], sizes = [8, 128], strides = [1, 1]} : vector<8x256xf32> to vector<8x128xf32>
    %23 = vector.extract_strided_slice %10 {offsets = [0, 256], sizes = [8, 128], strides = [1, 1]} : vector<8x384xf32> to vector<8x128xf32>
    %24 = vector.extract_strided_slice %12 {offsets = [0, 256], sizes = [8, 128], strides = [1, 1]} : vector<8x384xf32> to vector<8x128xf32>
    %25 = arith.addf %24, %6 : vector<8x128xf32>
    %26 = arith.mulf %21, %25 : vector<8x128xf32>
    %27 = arith.addf %23, %26 : vector<8x128xf32>
    %28 = math.tanh %27 : vector<8x128xf32>
    %cst_10 = arith.constant 1.000000e+00 : f32
    %29 = vector.broadcast %cst_10 : f32 to vector<8x128xf32>
    %30 = arith.subf %29, %22 : vector<8x128xf32>
    %31 = arith.mulf %30, %28 : vector<8x128xf32>
    %32 = arith.mulf %22, %7 : vector<8x128xf32>
    %33 = arith.addf %31, %32 : vector<8x128xf32>
    %c1_i32 = arith.constant 1 : i32
    %34 = arith.index_cast %c1_i32 : i32 to index
    %c0_11 = arith.constant 0 : index
    %c0_12 = arith.constant 0 : index
    %35 = vector.load %arg1[%34, %c0_11, %c0_12] : memref<8x8x384xf32, #tpu.memory_space<vmem>>, vector<1x8x384xf32>
    %36 = vector.shape_cast %35 : vector<1x8x384xf32> to vector<8x384xf32>
    %37 = arith.truncf %33 : vector<8x128xf32> to vector<8x128xbf16>
    %cst_13 = arith.constant dense<0.000000e+00> : vector<8x384xf32>
    %38 = tpu.matmul %37, %3, %cst_13 {dimension_numbers = #tpu.dot_dimension_numbers<[1], [0], [0], [1], [0, 0, 1, 1], [], []>} : vector<8x128xbf16>, vector<128x384xbf16>, vector<8x384xf32> -> vector<8x384xf32>
    %39 = vector.extract_strided_slice %36 {offsets = [0, 0], sizes = [8, 256], strides = [1, 1]} : vector<8x384xf32> to vector<8x256xf32>
    %40 = vector.extract_strided_slice %38 {offsets = [0, 0], sizes = [8, 256], strides = [1, 1]} : vector<8x384xf32> to vector<8x256xf32>
    %41 = arith.addf %39, %40 : vector<8x256xf32>
    %42 = arith.negf %41 : vector<8x256xf32>
    %43 = math.exp %42 : vector<8x256xf32>
    %cst_14 = arith.constant 1.000000e+00 : f32
    %44 = vector.broadcast %cst_14 : f32 to vector<8x256xf32>
    %45 = arith.addf %44, %43 : vector<8x256xf32>
    %46 = arith.divf %44, %45 : vector<8x256xf32>
    %47 = vector.extract_strided_slice %46 {offsets = [0, 0], sizes = [8, 128], strides = [1, 1]} : vector<8x256xf32> to vector<8x128xf32>
    %48 = vector.extract_strided_slice %46 {offsets = [0, 128], sizes = [8, 128], strides = [1, 1]} : vector<8x256xf32> to vector<8x128xf32>
    %49 = vector.extract_strided_slice %36 {offsets = [0, 256], sizes = [8, 128], strides = [1, 1]} : vector<8x384xf32> to vector<8x128xf32>
    %50 = vector.extract_strided_slice %38 {offsets = [0, 256], sizes = [8, 128], strides = [1, 1]} : vector<8x384xf32> to vector<8x128xf32>
    %51 = arith.addf %50, %6 : vector<8x128xf32>
    %52 = arith.mulf %47, %51 : vector<8x128xf32>
    %53 = arith.addf %49, %52 : vector<8x128xf32>
    %54 = math.tanh %53 : vector<8x128xf32>
    %cst_15 = arith.constant 1.000000e+00 : f32
    %55 = vector.broadcast %cst_15 : f32 to vector<8x128xf32>
    %56 = arith.subf %55, %48 : vector<8x128xf32>
    %57 = arith.mulf %56, %54 : vector<8x128xf32>
    %58 = arith.mulf %48, %33 : vector<8x128xf32>
    %59 = arith.addf %57, %58 : vector<8x128xf32>
    %c2_i32 = arith.constant 2 : i32
    %60 = arith.index_cast %c2_i32 : i32 to index
    %c0_16 = arith.constant 0 : index
    %c0_17 = arith.constant 0 : index
    %61 = vector.load %arg1[%60, %c0_16, %c0_17] : memref<8x8x384xf32, #tpu.memory_space<vmem>>, vector<1x8x384xf32>
    %62 = vector.shape_cast %61 : vector<1x8x384xf32> to vector<8x384xf32>
    %63 = arith.truncf %59 : vector<8x128xf32> to vector<8x128xbf16>
    %cst_18 = arith.constant dense<0.000000e+00> : vector<8x384xf32>
    %64 = tpu.matmul %63, %3, %cst_18 {dimension_numbers = #tpu.dot_dimension_numbers<[1], [0], [0], [1], [0, 0, 1, 1], [], []>} : vector<8x128xbf16>, vector<128x384xbf16>, vector<8x384xf32> -> vector<8x384xf32>
    %65 = vector.extract_strided_slice %62 {offsets = [0, 0], sizes = [8, 256], strides = [1, 1]} : vector<8x384xf32> to vector<8x256xf32>
    %66 = vector.extract_strided_slice %64 {offsets = [0, 0], sizes = [8, 256], strides = [1, 1]} : vector<8x384xf32> to vector<8x256xf32>
    %67 = arith.addf %65, %66 : vector<8x256xf32>
    %68 = arith.negf %67 : vector<8x256xf32>
    %69 = math.exp %68 : vector<8x256xf32>
    %cst_19 = arith.constant 1.000000e+00 : f32
    %70 = vector.broadcast %cst_19 : f32 to vector<8x256xf32>
    %71 = arith.addf %70, %69 : vector<8x256xf32>
    %72 = arith.divf %70, %71 : vector<8x256xf32>
    %73 = vector.extract_strided_slice %72 {offsets = [0, 0], sizes = [8, 128], strides = [1, 1]} : vector<8x256xf32> to vector<8x128xf32>
    %74 = vector.extract_strided_slice %72 {offsets = [0, 128], sizes = [8, 128], strides = [1, 1]} : vector<8x256xf32> to vector<8x128xf32>
    %75 = vector.extract_strided_slice %62 {offsets = [0, 256], sizes = [8, 128], strides = [1, 1]} : vector<8x384xf32> to vector<8x128xf32>
    %76 = vector.extract_strided_slice %64 {offsets = [0, 256], sizes = [8, 128], strides = [1, 1]} : vector<8x384xf32> to vector<8x128xf32>
    %77 = arith.addf %76, %6 : vector<8x128xf32>
    %78 = arith.mulf %73, %77 : vector<8x128xf32>
    %79 = arith.addf %75, %78 : vector<8x128xf32>
    %80 = math.tanh %79 : vector<8x128xf32>
    %cst_20 = arith.constant 1.000000e+00 : f32
    %81 = vector.broadcast %cst_20 : f32 to vector<8x128xf32>
    %82 = arith.subf %81, %74 : vector<8x128xf32>
    %83 = arith.mulf %82, %80 : vector<8x128xf32>
    %84 = arith.mulf %74, %59 : vector<8x128xf32>
    %85 = arith.addf %83, %84 : vector<8x128xf32>
    %c3_i32 = arith.constant 3 : i32
    %86 = arith.index_cast %c3_i32 : i32 to index
    %c0_21 = arith.constant 0 : index
    %c0_22 = arith.constant 0 : index
    %87 = vector.load %arg1[%86, %c0_21, %c0_22] : memref<8x8x384xf32, #tpu.memory_space<vmem>>, vector<1x8x384xf32>
    %88 = vector.shape_cast %87 : vector<1x8x384xf32> to vector<8x384xf32>
    %89 = arith.truncf %85 : vector<8x128xf32> to vector<8x128xbf16>
    %cst_23 = arith.constant dense<0.000000e+00> : vector<8x384xf32>
    %90 = tpu.matmul %89, %3, %cst_23 {dimension_numbers = #tpu.dot_dimension_numbers<[1], [0], [0], [1], [0, 0, 1, 1], [], []>} : vector<8x128xbf16>, vector<128x384xbf16>, vector<8x384xf32> -> vector<8x384xf32>
    %91 = vector.extract_strided_slice %88 {offsets = [0, 0], sizes = [8, 256], strides = [1, 1]} : vector<8x384xf32> to vector<8x256xf32>
    %92 = vector.extract_strided_slice %90 {offsets = [0, 0], sizes = [8, 256], strides = [1, 1]} : vector<8x384xf32> to vector<8x256xf32>
    %93 = arith.addf %91, %92 : vector<8x256xf32>
    %94 = arith.negf %93 : vector<8x256xf32>
    %95 = math.exp %94 : vector<8x256xf32>
    %cst_24 = arith.constant 1.000000e+00 : f32
    %96 = vector.broadcast %cst_24 : f32 to vector<8x256xf32>
    %97 = arith.addf %96, %95 : vector<8x256xf32>
    %98 = arith.divf %96, %97 : vector<8x256xf32>
    %99 = vector.extract_strided_slice %98 {offsets = [0, 0], sizes = [8, 128], strides = [1, 1]} : vector<8x256xf32> to vector<8x128xf32>
    %100 = vector.extract_strided_slice %98 {offsets = [0, 128], sizes = [8, 128], strides = [1, 1]} : vector<8x256xf32> to vector<8x128xf32>
    %101 = vector.extract_strided_slice %88 {offsets = [0, 256], sizes = [8, 128], strides = [1, 1]} : vector<8x384xf32> to vector<8x128xf32>
    %102 = vector.extract_strided_slice %90 {offsets = [0, 256], sizes = [8, 128], strides = [1, 1]} : vector<8x384xf32> to vector<8x128xf32>
    %103 = arith.addf %102, %6 : vector<8x128xf32>
    %104 = arith.mulf %99, %103 : vector<8x128xf32>
    %105 = arith.addf %101, %104 : vector<8x128xf32>
    %106 = math.tanh %105 : vector<8x128xf32>
    %cst_25 = arith.constant 1.000000e+00 : f32
    %107 = vector.broadcast %cst_25 : f32 to vector<8x128xf32>
    %108 = arith.subf %107, %100 : vector<8x128xf32>
    %109 = arith.mulf %108, %106 : vector<8x128xf32>
    %110 = arith.mulf %100, %85 : vector<8x128xf32>
    %111 = arith.addf %109, %110 : vector<8x128xf32>
    %c4_i32 = arith.constant 4 : i32
    %112 = arith.index_cast %c4_i32 : i32 to index
    %c0_26 = arith.constant 0 : index
    %c0_27 = arith.constant 0 : index
    %113 = vector.load %arg1[%112, %c0_26, %c0_27] : memref<8x8x384xf32, #tpu.memory_space<vmem>>, vector<1x8x384xf32>
    %114 = vector.shape_cast %113 : vector<1x8x384xf32> to vector<8x384xf32>
    %115 = arith.truncf %111 : vector<8x128xf32> to vector<8x128xbf16>
    %cst_28 = arith.constant dense<0.000000e+00> : vector<8x384xf32>
    %116 = tpu.matmul %115, %3, %cst_28 {dimension_numbers = #tpu.dot_dimension_numbers<[1], [0], [0], [1], [0, 0, 1, 1], [], []>} : vector<8x128xbf16>, vector<128x384xbf16>, vector<8x384xf32> -> vector<8x384xf32>
    %117 = vector.extract_strided_slice %114 {offsets = [0, 0], sizes = [8, 256], strides = [1, 1]} : vector<8x384xf32> to vector<8x256xf32>
    %118 = vector.extract_strided_slice %116 {offsets = [0, 0], sizes = [8, 256], strides = [1, 1]} : vector<8x384xf32> to vector<8x256xf32>
    %119 = arith.addf %117, %118 : vector<8x256xf32>
    %120 = arith.negf %119 : vector<8x256xf32>
    %121 = math.exp %120 : vector<8x256xf32>
    %cst_29 = arith.constant 1.000000e+00 : f32
    %122 = vector.broadcast %cst_29 : f32 to vector<8x256xf32>
    %123 = arith.addf %122, %121 : vector<8x256xf32>
    %124 = arith.divf %122, %123 : vector<8x256xf32>
    %125 = vector.extract_strided_slice %124 {offsets = [0, 0], sizes = [8, 128], strides = [1, 1]} : vector<8x256xf32> to vector<8x128xf32>
    %126 = vector.extract_strided_slice %124 {offsets = [0, 128], sizes = [8, 128], strides = [1, 1]} : vector<8x256xf32> to vector<8x128xf32>
    %127 = vector.extract_strided_slice %114 {offsets = [0, 256], sizes = [8, 128], strides = [1, 1]} : vector<8x384xf32> to vector<8x128xf32>
    %128 = vector.extract_strided_slice %116 {offsets = [0, 256], sizes = [8, 128], strides = [1, 1]} : vector<8x384xf32> to vector<8x128xf32>
    %129 = arith.addf %128, %6 : vector<8x128xf32>
    %130 = arith.mulf %125, %129 : vector<8x128xf32>
    %131 = arith.addf %127, %130 : vector<8x128xf32>
    %132 = math.tanh %131 : vector<8x128xf32>
    %cst_30 = arith.constant 1.000000e+00 : f32
    %133 = vector.broadcast %cst_30 : f32 to vector<8x128xf32>
    %134 = arith.subf %133, %126 : vector<8x128xf32>
    %135 = arith.mulf %134, %132 : vector<8x128xf32>
    %136 = arith.mulf %126, %111 : vector<8x128xf32>
    %137 = arith.addf %135, %136 : vector<8x128xf32>
    %c5_i32 = arith.constant 5 : i32
    %138 = arith.index_cast %c5_i32 : i32 to index
    %c0_31 = arith.constant 0 : index
    %c0_32 = arith.constant 0 : index
    %139 = vector.load %arg1[%138, %c0_31, %c0_32] : memref<8x8x384xf32, #tpu.memory_space<vmem>>, vector<1x8x384xf32>
    %140 = vector.shape_cast %139 : vector<1x8x384xf32> to vector<8x384xf32>
    %141 = arith.truncf %137 : vector<8x128xf32> to vector<8x128xbf16>
    %cst_33 = arith.constant dense<0.000000e+00> : vector<8x384xf32>
    %142 = tpu.matmul %141, %3, %cst_33 {dimension_numbers = #tpu.dot_dimension_numbers<[1], [0], [0], [1], [0, 0, 1, 1], [], []>} : vector<8x128xbf16>, vector<128x384xbf16>, vector<8x384xf32> -> vector<8x384xf32>
    %143 = vector.extract_strided_slice %140 {offsets = [0, 0], sizes = [8, 256], strides = [1, 1]} : vector<8x384xf32> to vector<8x256xf32>
    %144 = vector.extract_strided_slice %142 {offsets = [0, 0], sizes = [8, 256], strides = [1, 1]} : vector<8x384xf32> to vector<8x256xf32>
    %145 = arith.addf %143, %144 : vector<8x256xf32>
    %146 = arith.negf %145 : vector<8x256xf32>
    %147 = math.exp %146 : vector<8x256xf32>
    %cst_34 = arith.constant 1.000000e+00 : f32
    %148 = vector.broadcast %cst_34 : f32 to vector<8x256xf32>
    %149 = arith.addf %148, %147 : vector<8x256xf32>
    %150 = arith.divf %148, %149 : vector<8x256xf32>
    %151 = vector.extract_strided_slice %150 {offsets = [0, 0], sizes = [8, 128], strides = [1, 1]} : vector<8x256xf32> to vector<8x128xf32>
    %152 = vector.extract_strided_slice %150 {offsets = [0, 128], sizes = [8, 128], strides = [1, 1]} : vector<8x256xf32> to vector<8x128xf32>
    %153 = vector.extract_strided_slice %140 {offsets = [0, 256], sizes = [8, 128], strides = [1, 1]} : vector<8x384xf32> to vector<8x128xf32>
    %154 = vector.extract_strided_slice %142 {offsets = [0, 256], sizes = [8, 128], strides = [1, 1]} : vector<8x384xf32> to vector<8x128xf32>
    %155 = arith.addf %154, %6 : vector<8x128xf32>
    %156 = arith.mulf %151, %155 : vector<8x128xf32>
    %157 = arith.addf %153, %156 : vector<8x128xf32>
    %158 = math.tanh %157 : vector<8x128xf32>
    %cst_35 = arith.constant 1.000000e+00 : f32
    %159 = vector.broadcast %cst_35 : f32 to vector<8x128xf32>
    %160 = arith.subf %159, %152 : vector<8x128xf32>
    %161 = arith.mulf %160, %158 : vector<8x128xf32>
    %162 = arith.mulf %152, %137 : vector<8x128xf32>
    %163 = arith.addf %161, %162 : vector<8x128xf32>
    %c6_i32 = arith.constant 6 : i32
    %164 = arith.index_cast %c6_i32 : i32 to index
    %c0_36 = arith.constant 0 : index
    %c0_37 = arith.constant 0 : index
    %165 = vector.load %arg1[%164, %c0_36, %c0_37] : memref<8x8x384xf32, #tpu.memory_space<vmem>>, vector<1x8x384xf32>
    %166 = vector.shape_cast %165 : vector<1x8x384xf32> to vector<8x384xf32>
    %167 = arith.truncf %163 : vector<8x128xf32> to vector<8x128xbf16>
    %cst_38 = arith.constant dense<0.000000e+00> : vector<8x384xf32>
    %168 = tpu.matmul %167, %3, %cst_38 {dimension_numbers = #tpu.dot_dimension_numbers<[1], [0], [0], [1], [0, 0, 1, 1], [], []>} : vector<8x128xbf16>, vector<128x384xbf16>, vector<8x384xf32> -> vector<8x384xf32>
    %169 = vector.extract_strided_slice %166 {offsets = [0, 0], sizes = [8, 256], strides = [1, 1]} : vector<8x384xf32> to vector<8x256xf32>
    %170 = vector.extract_strided_slice %168 {offsets = [0, 0], sizes = [8, 256], strides = [1, 1]} : vector<8x384xf32> to vector<8x256xf32>
    %171 = arith.addf %169, %170 : vector<8x256xf32>
    %172 = arith.negf %171 : vector<8x256xf32>
    %173 = math.exp %172 : vector<8x256xf32>
    %cst_39 = arith.constant 1.000000e+00 : f32
    %174 = vector.broadcast %cst_39 : f32 to vector<8x256xf32>
    %175 = arith.addf %174, %173 : vector<8x256xf32>
    %176 = arith.divf %174, %175 : vector<8x256xf32>
    %177 = vector.extract_strided_slice %176 {offsets = [0, 0], sizes = [8, 128], strides = [1, 1]} : vector<8x256xf32> to vector<8x128xf32>
    %178 = vector.extract_strided_slice %176 {offsets = [0, 128], sizes = [8, 128], strides = [1, 1]} : vector<8x256xf32> to vector<8x128xf32>
    %179 = vector.extract_strided_slice %166 {offsets = [0, 256], sizes = [8, 128], strides = [1, 1]} : vector<8x384xf32> to vector<8x128xf32>
    %180 = vector.extract_strided_slice %168 {offsets = [0, 256], sizes = [8, 128], strides = [1, 1]} : vector<8x384xf32> to vector<8x128xf32>
    %181 = arith.addf %180, %6 : vector<8x128xf32>
    %182 = arith.mulf %177, %181 : vector<8x128xf32>
    %183 = arith.addf %179, %182 : vector<8x128xf32>
    %184 = math.tanh %183 : vector<8x128xf32>
    %cst_40 = arith.constant 1.000000e+00 : f32
    %185 = vector.broadcast %cst_40 : f32 to vector<8x128xf32>
    %186 = arith.subf %185, %178 : vector<8x128xf32>
    %187 = arith.mulf %186, %184 : vector<8x128xf32>
    %188 = arith.mulf %178, %163 : vector<8x128xf32>
    %189 = arith.addf %187, %188 : vector<8x128xf32>
    %c7_i32 = arith.constant 7 : i32
    %190 = arith.index_cast %c7_i32 : i32 to index
    %c0_41 = arith.constant 0 : index
    %c0_42 = arith.constant 0 : index
    %191 = vector.load %arg1[%190, %c0_41, %c0_42] : memref<8x8x384xf32, #tpu.memory_space<vmem>>, vector<1x8x384xf32>
    %192 = vector.shape_cast %191 : vector<1x8x384xf32> to vector<8x384xf32>
    %193 = arith.truncf %189 : vector<8x128xf32> to vector<8x128xbf16>
    %cst_43 = arith.constant dense<0.000000e+00> : vector<8x384xf32>
    %194 = tpu.matmul %193, %3, %cst_43 {dimension_numbers = #tpu.dot_dimension_numbers<[1], [0], [0], [1], [0, 0, 1, 1], [], []>} : vector<8x128xbf16>, vector<128x384xbf16>, vector<8x384xf32> -> vector<8x384xf32>
    %195 = vector.extract_strided_slice %192 {offsets = [0, 0], sizes = [8, 256], strides = [1, 1]} : vector<8x384xf32> to vector<8x256xf32>
    %196 = vector.extract_strided_slice %194 {offsets = [0, 0], sizes = [8, 256], strides = [1, 1]} : vector<8x384xf32> to vector<8x256xf32>
    %197 = arith.addf %195, %196 : vector<8x256xf32>
    %198 = arith.negf %197 : vector<8x256xf32>
    %199 = math.exp %198 : vector<8x256xf32>
    %cst_44 = arith.constant 1.000000e+00 : f32
    %200 = vector.broadcast %cst_44 : f32 to vector<8x256xf32>
    %201 = arith.addf %200, %199 : vector<8x256xf32>
    %202 = arith.divf %200, %201 : vector<8x256xf32>
    %203 = vector.extract_strided_slice %202 {offsets = [0, 0], sizes = [8, 128], strides = [1, 1]} : vector<8x256xf32> to vector<8x128xf32>
    %204 = vector.extract_strided_slice %202 {offsets = [0, 128], sizes = [8, 128], strides = [1, 1]} : vector<8x256xf32> to vector<8x128xf32>
    %205 = vector.extract_strided_slice %192 {offsets = [0, 256], sizes = [8, 128], strides = [1, 1]} : vector<8x384xf32> to vector<8x128xf32>
    %206 = vector.extract_strided_slice %194 {offsets = [0, 256], sizes = [8, 128], strides = [1, 1]} : vector<8x384xf32> to vector<8x128xf32>
    %207 = arith.addf %206, %6 : vector<8x128xf32>
    %208 = arith.mulf %203, %207 : vector<8x128xf32>
    %209 = arith.addf %205, %208 : vector<8x128xf32>
    %210 = math.tanh %209 : vector<8x128xf32>
    %cst_45 = arith.constant 1.000000e+00 : f32
    %211 = vector.broadcast %cst_45 : f32 to vector<8x128xf32>
    %212 = arith.subf %211, %204 : vector<8x128xf32>
    %213 = arith.mulf %212, %210 : vector<8x128xf32>
    %214 = arith.mulf %204, %189 : vector<8x128xf32>
    %215 = arith.addf %213, %214 : vector<8x128xf32>
    %c8_i32 = arith.constant 8 : i32
    %c0_46 = arith.constant 0 : index
    %c0_47 = arith.constant 0 : index
    %216 = vector.load %arg6[%c0_46, %c0_47] : memref<8x128xf32, #tpu.memory_space<vmem>>, vector<8x128xf32>
    tpu.vector_store %arg6[%c0_46, %c0_47], %215 {strides = array<i32>} : memref<8x128xf32, #tpu.memory_space<vmem>>, vector<8x128xf32>,
    %c0_i32_48 = arith.constant 0 : i32
    %217 = arith.cmpi eq, %arg0, %c0_i32_48 : i32
    %218 = arith.extui %217 : i1 to i32
    %c0_i32_49 = arith.constant 0 : i32
    %219 = arith.cmpi ne, %218, %c0_i32_49 : i32
    scf.if %219 {
      %cst_50 = arith.constant 0.000000e+00 : f32
      %220 = vector.broadcast %cst_50 : f32 to vector<8x128xf32>
      %221 = arith.maximumf %215, %220 : vector<8x128xf32>
      %c0_51 = arith.constant 0 : index
      %c0_52 = arith.constant 0 : index
      %222 = vector.load %arg5[%c0_51, %c0_52] : memref<8x128xf32, #tpu.memory_space<vmem>>, vector<8x128xf32>
      tpu.vector_store %arg5[%c0_51, %c0_52], %221 {strides = array<i32>} : memref<8x128xf32, #tpu.memory_space<vmem>>, vector<8x128xf32>,
    } else {
    }
    return
  }
  func.func @transform_0(%arg0: i32) -> (i32, i32, i32) {
    %c0_i32 = arith.constant 0 : i32
    %c0_i32_0 = arith.constant 0 : i32
    %c0_i32_1 = arith.constant 0 : i32
    return %arg0, %c0_i32, %c0_i32_0 : i32, i32, i32
  }
  func.func @transform_2(%arg0: i32) -> (i32, i32) {
    %c0_i32 = arith.constant 0 : i32
    %c0_i32_0 = arith.constant 0 : i32
    %c0_i32_1 = arith.constant 0 : i32
    return %c0_i32, %c0_i32_0 : i32, i32
  }
  func.func @transform_3(%arg0: i32) -> (i32, i32) {
    %c0_i32 = arith.constant 0 : i32
    %c0_i32_0 = arith.constant 0 : i32
    %c0_i32_1 = arith.constant 0 : i32
    return %c0_i32, %c0_i32_0 : i32, i32
  }
  func.func @transform_4(%arg0: i32) -> (i32, i32) {
    %c0_i32 = arith.constant 0 : i32
    %c0_i32_0 = arith.constant 0 : i32
    %c0_i32_1 = arith.constant 0 : i32
    return %c0_i32, %c0_i32_0 : i32, i32
  }
  func.func @transform_5(%arg0: i32) -> (i32, i32) {
    %c0_i32 = arith.constant 0 : i32
    %c0_i32_0 = arith.constant 0 : i32
    %c0_i32_1 = arith.constant 0 : i32
    return %c0_i32, %c0_i32_0 : i32, i32
  }
}

</mosaic_0001>

<bundles_post_ra>
// kernel: tpu_custom_call.1
= control target key start
LH: loop header
LB: loop body
LE: loop exit
PB: predicated region body
PF: predicated region fallthrough
CT: control target
= control target key end

     0   :  { %11 = vsyncpa [#allocation4], 0  ;;  %s1709_s0 = inlined_call_operand.hbm [shape: f32[8,8,384], index: 0, kind: input, shape index: {}]   ;;  %s1710_s1 = inlined_call_operand.hbm [shape: bf16[128,384], index: 1, kind: input, shape index: {}]   ;;  %s1711_s2 = inlined_call_operand.vmem [shape: f32[1,128], index: 2, kind: input, shape index: {}]   ;;  %s1712_s3 = inlined_call_operand.hbm [shape: f32[8,128], index: 3, kind: input, shape index: {}]   ;;  %s1713_s4 = inlined_call_operand.hbm [shape: f32[8,128], index: 4, kind: output, shape index: {0}]   ;;  %s1714_s5 = inlined_call_operand.hbm [shape: f32[8,128], index: 5, kind: output, shape index: {1}]  }
   0x1   :  { %12 = vsyncpa [#allocation7], 0 }
   0x2   :  { %13 = vsyncpa [#allocation5], 0 }
   0x3   :  { %14 = vsyncpa [#allocation10], 0  ;;  %s19_s20 = sshll.u32 %s1709_s0, 4  ;;  %s1367_s21 = smov [#allocation3]   ;;  %s20_s20 = int_to_ptr.hbm [resolvable:$true] %s19_s20 }
   0x4   :  { %s21_s22 = sshll.u32 %s1367_s21, 4  ;;  %s35_s25 = sshll.u32 %s1712_s3, 4  ;;  %s22_s22 = int_to_ptr.vmem [resolvable:$true] %s21_s22  ;;  %s36_s25 = int_to_ptr.hbm [resolvable:$true] %s35_s25 }
   0x5   :  { %s1368_s26 = smov 384   ;;  %s1369_s27 = smov 24  }
   0x6   :  { %27 = dma.hbm_to_vmem [thread:$0]  %s20_s20, 3072, %s22_s22, [#allocation4], %s1368_s26, %s1368_s26, %s1369_s27  }
   0x7   :  { %s1370_s28 = smov [#allocation6]  }
   0x8   :  { %s37_s29 = sshll.u32 %s1370_s28, 4  ;;  %s38_s29 = int_to_ptr.vmem [resolvable:$true] %s37_s29 }
   0x9   :  { %40 = dma.hbm_to_vmem [thread:$0]  %s36_s25, 128, %s38_s29, [#allocation7]  }
   0xa   :  { %1357 = dma.done.wait [#allocation4], 3072  }
   0xb   :  { %1358 = vsyncadd [#allocation4], 4294964224 }
   0xc   :  { %1359 = dma.done.wait [#allocation7], 128  }
   0xd   :  { %1360 = vsyncadd [#allocation7], 4294967168 }
   0xe   :  { %s60_s6 = sshll.u32 %s1710_s1, 4  ;;  %s1371_s7 = smov [#allocation2]   ;;  %s61_s6 = int_to_ptr.hbm [resolvable:$true] %s60_s6 }
   0xf   :  { %s62_s8 = sshll.u32 %s1371_s7, 4  ;;  %s63_s8 = int_to_ptr.vmem [resolvable:$true] %s62_s8 }
  0x10   :  { %65 = dma.hbm_to_vmem [thread:$0]  %s61_s6, 3072, %s63_s8, [#allocation11] }
  0x11   :  { %1361 = dma.done.wait [#allocation11], 3072 }
  0x12   :  { %1362 = vsyncadd [#allocation11], 4294964224  ;;  %v1098_v0 = vld [vmem:[#allocation2 + $0xa8] sm:$0xf]  ;;  %v1146_v1 = vld [vmem:[#allocation2 + $0xb0] sm:$0xf0] }
  0x13   :  { %v1145_v2 = vld [vmem:[#allocation2 + $0xac] sm:$0xf]  ;;  %v1413_v3 = vor.u32 %v1146_v1, %v1098_v0  ;;  %v1100_v4 = vld [vmem:[#allocation2 + $0xb4] sm:$0xf0]  ;;  %v1086_v5 = vld [vmem:[#allocation2 + $0x90] sm:$0xf] }
  0x14   :  { %v1143_v6 = vld [vmem:[#allocation2 + $0x98] sm:$0xf0]  ;;  %v1415_v7 = vor.u32 %v1145_v2, %v1100_v4  ;;  %v1142_v8 = vld [vmem:[#allocation2 + $0x94] sm:$0xf]  ;;  %v1088_v9 = vld [vmem:[#allocation2 + $0x9c] sm:$0xf0] }
  0x15   :  { %241 = vmatpush.bf16.msra.mxu0 %v1413_v3  ;;  %v1418_v10 = vor.u32 %v1143_v6, %v1086_v5  ;;  %333 = vmatpush.bf16.msra.mxu3 %v1413_v3  ;;  %v1422_v11 = vor.u32 %v1142_v8, %v1088_v9  ;;  %v1074_v12 = vld [vmem:[#allocation2 + $0x78] sm:$0xf]  ;;  %v1140_v13 = vld [vmem:[#allocation2 + $0x80] sm:$0xf0]  ;;  %v1139_v14 = vld [vmem:[#allocation2 + $0x7c] sm:$0xf] }
  0x16   :  { %254 = vmatpush.bf16.msra.mxu1 %v1415_v7  ;;  %v1076_v15 = vld [vmem:[#allocation2 + $0x84] sm:$0xf0]  ;;  %v1106_v16 = vld [vmem:[#allocation2 + $0xb0] sm:$0xf]  ;;  %v1147_v17 = vld [vmem:[#allocation2 + $0xb8] sm:$0xf0]  ;;  %v1427_v19 = vor.u32 %v1140_v13, %v1074_v12 }
  0x17   :  { %v1424_v18 = vor.u32 %v1147_v17, %v1106_v16  ;;  %v1094_v20 = vld [vmem:[#allocation2 + $0x98] sm:$0xf]  ;;  %v1144_v21 = vld [vmem:[#allocation2 + $0xa0] sm:$0xf0]  ;;  %v1431_v22 = vor.u32 %v1139_v14, %v1076_v15  ;;  %v1062_v23 = vld [vmem:[#allocation2 + $0x60] sm:$0xf] }
  0x18   :  { %v1137_v24 = vld [vmem:[#allocation2 + $0x68] sm:$0xf0]  ;;  %v1136_v25 = vld [vmem:[#allocation2 + $0x64] sm:$0xf]  ;;  %v1434_v26 = vor.u32 %v1144_v21, %v1094_v20  ;;  %v1064_v27 = vld [vmem:[#allocation2 + $0x6c] sm:$0xf0] }
  0x19   :  { %242 = vmatpush.bf16.msra.mxu0 %v1418_v10  ;;  %334 = vmatpush.bf16.msra.mxu3 %v1418_v10  ;;  %v1082_v28 = vld [vmem:[#allocation2 + $0x80] sm:$0xf]  ;;  %v1141_v29 = vld [vmem:[#allocation2 + $0x88] sm:$0xf0]  ;;  %v1437_v30 = vor.u32 %v1137_v24, %v1062_v23  ;;  %v1441_v31 = vor.u32 %v1136_v25, %v1064_v27  ;;  %v1050_v32 = vld [vmem:[#allocation2 + $0x48] sm:$0xf] }
  0x1a   :  { %255 = vmatpush.bf16.msra.mxu1 %v1422_v11  ;;  %267 = vmatpush.bf16.msra.mxu2 %v1424_v18  ;;  %v1134_v33 = vld [vmem:[#allocation2 + $0x50] sm:$0xf0]  ;;  %v1133_v34 = vld [vmem:[#allocation2 + $0x4c] sm:$0xf]  ;;  %v1444_v35 = vor.u32 %v1141_v29, %v1082_v28  ;;  %v1052_v36 = vld [vmem:[#allocation2 + $0x54] sm:$0xf0] }
  0x1b   :  { %v1070_v37 = vld [vmem:[#allocation2 + $0x68] sm:$0xf]  ;;  %v1138_v38 = vld [vmem:[#allocation2 + $0x70] sm:$0xf0]  ;;  %v1447_v39 = vor.u32 %v1134_v33, %v1050_v32  ;;  %v1038_v40 = vld [vmem:[#allocation2 + $0x30] sm:$0xf]  ;;  %v1451_v41 = vor.u32 %v1133_v34, %v1052_v36 }
  0x1c   :  { %v1131_v42 = vld [vmem:[#allocation2 + $0x38] sm:$0xf0]  ;;  %v1130_v43 = vld [vmem:[#allocation2 + $0x34] sm:$0xf]  ;;  %v1454_v44 = vor.u32 %v1138_v38, %v1070_v37  ;;  %v1040_v45 = vld [vmem:[#allocation2 + $0x3c] sm:$0xf0] }
  0x1d   :  { %243 = vmatpush.bf16.msra.mxu0 %v1427_v19  ;;  %335 = vmatpush.bf16.msra.mxu3 %v1427_v19  ;;  %v1058_v46 = vld [vmem:[#allocation2 + $0x50] sm:$0xf]  ;;  %v1135_v47 = vld [vmem:[#allocation2 + $0x58] sm:$0xf0]  ;;  %v1457_v48 = vor.u32 %v1131_v42, %v1038_v40  ;;  %v1461_v49 = vor.u32 %v1130_v43, %v1040_v45  ;;  %v1026_v50 = vld [vmem:[#allocation2 + $0x18] sm:$0xf] }
  0x1e   :  { %256 = vmatpush.bf16.msra.mxu1 %v1431_v22  ;;  %268 = vmatpush.bf16.msra.mxu2 %v1434_v26  ;;  %v1128_v51 = vld [vmem:[#allocation2 + $0x20] sm:$0xf0]  ;;  %v1127_v52 = vld [vmem:[#allocation2 + $0x1c] sm:$0xf]  ;;  %v1464_v53 = vor.u32 %v1135_v47, %v1058_v46  ;;  %v1028_v54 = vld [vmem:[#allocation2 + $0x24] sm:$0xf0] }
  0x1f   :  { %v1046_v55 = vld [vmem:[#allocation2 + $0x38] sm:$0xf]  ;;  %v1132_v56 = vld [vmem:[#allocation2 + $0x40] sm:$0xf0]  ;;  %v1467_v57 = vor.u32 %v1128_v51, %v1026_v50  ;;  %v1471_v58 = vor.u32 %v1127_v52, %v1028_v54  ;;  %v1014_v59 = vld [vmem:[#allocation2] sm:$0xf] }
  0x20   :  { %v1125_v60 = vld [vmem:[#allocation2 + $0x8] sm:$0xf0]  ;;  %v1124_v61 = vld [vmem:[#allocation2 + $0x4] sm:$0xf]  ;;  %v1474_v62 = vor.u32 %v1132_v56, %v1046_v55  ;;  %v1016_v63 = vld [vmem:[#allocation2 + $0xc] sm:$0xf0] }
  0x21   :  { %244 = vmatpush.bf16.msra.mxu0 %v1437_v30  ;;  %336 = vmatpush.bf16.msra.mxu3 %v1437_v30  ;;  %v1034_v0 = vld [vmem:[#allocation2 + $0x20] sm:$0xf]  ;;  %v1129_v1 = vld [vmem:[#allocation2 + $0x28] sm:$0xf0]  ;;  %v1477_v2 = vor.u32 %v1125_v60, %v1014_v59  ;;  %v1483_v5 = vor.u32 %v1124_v61, %v1016_v63  ;;  %v1022_v8 = vld [vmem:[#allocation2 + $0x8] sm:$0xf] }
  0x22   :  { %257 = vmatpush.bf16.msra.mxu1 %v1441_v31  ;;  %269 = vmatpush.bf16.msra.mxu2 %v1444_v35  ;;  %v1479_v4 = vld [vmem:[#allocation6] sm:$0xff]  ;;  %v1486_v6 = vor.u32 %v1129_v1, %v1034_v0  ;;  %v1126_v9 = vld [vmem:[#allocation2 + $0x10] sm:$0xf0]  ;;  %v110_v15 = vld [vmem:[#allocation3 + $0x8] sm:$0xff]  ;;  %s996_s14 = sshll.u32 %s1714_s5, 4  ;;  %s1373_s15 = smov [#allocation8]   ;;  %s997_s14 = int_to_ptr.hbm [resolvable:$true] %s996_s14 }
  0x23   :  { %v112_v12 = vpack.c.bf16 %v1479_v4, %v1479_v4  ;;  %v1494_v13 = vor.u32 %v1126_v9, %v1022_v8  ;;  %v109_v14 = vld [vmem:[#allocation3] sm:$0xff]  ;;  %v111_v60 = vld [vmem:[#allocation3 + $0x10] sm:$0xff]  ;;  %s983_s16 = sshll.u32 %s1373_s15, 4  ;;  %s985_s19 = sshll.u32 %s1713_s4, 4  ;;  %s984_s16 = int_to_ptr.vmem [resolvable:$true] %s983_s16  ;;  %s986_s19 = int_to_ptr.hbm [resolvable:$true] %s985_s19 }
  0x24   :  { %v1556_v43 = vld [vmem:[%s1711_s2] ss:$0 sm:$0xff] }
  0x25   :  { %245 = vmatpush.bf16.msra.mxu0 %v1447_v39  ;;  %337 = vmatpush.bf16.msra.mxu3 %v1447_v39 }
  0x26   :  { %258 = vmatpush.bf16.msra.mxu1 %v1451_v41  ;;  %270 = vmatpush.bf16.msra.mxu2 %v1454_v44 }
  0x29   :  { %246 = vmatpush.bf16.msra.mxu0 %v1457_v48  ;;  %338 = vmatpush.bf16.msra.mxu3 %v1457_v48 }
  0x2a   :  { %259 = vmatpush.bf16.msra.mxu1 %v1461_v49  ;;  %271 = vmatpush.bf16.msra.mxu2 %v1464_v53 }
  0x2d   :  { %247 = vmatpush.bf16.msra.mxu0 %v1467_v57  ;;  %339 = vmatpush.bf16.msra.mxu3 %v1467_v57 }
  0x2e   :  { %260 = vmatpush.bf16.msra.mxu1 %v1471_v58  ;;  %272 = vmatpush.bf16.msra.mxu2 %v1474_v62 }
  0x31   :  { %248 = vmatpush.bf16.msra.mxu0 %v1477_v2  ;;  %340 = vmatpush.bf16.msra.mxu3 %v1477_v2 }
  0x32   :  { %261 = vmatpush.bf16.msra.mxu1 %v1483_v5  ;;  %273 = vmatpush.bf16.msra.mxu2 %v1486_v6 }
  0x34   :  { %249 = vmatmul.bf16.vlgmr.msra.gmra.mxu0 %v112_v12 }
  0x35   :  { %346 = vmatpush.bf16.msrb.mxu0 %v1415_v7  ;;  %438 = vmatpush.bf16.msrb.mxu3 %v1415_v7 }
  0x36   :  { %359 = vmatpush.bf16.msrb.mxu1 %v1424_v18  ;;  %274 = vmatpush.bf16.msra.mxu2 %v1494_v13 }
  0x37   :  { %262 = vmatmul.bf16.vlgmr.msra.gmra.mxu1 %v112_v12 }
  0x39   :  { %347 = vmatpush.bf16.msrb.mxu0 %v1422_v11  ;;  %439 = vmatpush.bf16.msrb.mxu3 %v1422_v11 }
  0x3a   :  { %360 = vmatpush.bf16.msrb.mxu1 %v1434_v26  ;;  %425 = vmatpush.bf16.msrb.mxu2 %v1413_v3 }
  0x3b   :  { %275 = vmatmul.bf16.vlgmr.msra.gmra.mxu2 %v112_v12 }
  0x3d   :  { %348 = vmatpush.bf16.msrb.mxu0 %v1431_v22  ;;  %440 = vmatpush.bf16.msrb.mxu3 %v1431_v22 }
  0x3e   :  { %361 = vmatpush.bf16.msrb.mxu1 %v1444_v35  ;;  %426 = vmatpush.bf16.msrb.mxu2 %v1418_v10 }
  0x41   :  { %349 = vmatpush.bf16.msrb.mxu0 %v1441_v31  ;;  %441 = vmatpush.bf16.msrb.mxu3 %v1441_v31 }
  0x42   :  { %362 = vmatpush.bf16.msrb.mxu1 %v1454_v44  ;;  %427 = vmatpush.bf16.msrb.mxu2 %v1427_v19 }
  0x45   :  { %350 = vmatpush.bf16.msrb.mxu0 %v1451_v41  ;;  %442 = vmatpush.bf16.msrb.mxu3 %v1451_v41 }
  0x46   :  { %363 = vmatpush.bf16.msrb.mxu1 %v1464_v53  ;;  %428 = vmatpush.bf16.msrb.mxu2 %v1437_v30 }
  0x49   :  { %351 = vmatpush.bf16.msrb.mxu0 %v1461_v49  ;;  %443 = vmatpush.bf16.msrb.mxu3 %v1461_v49 }
  0x4a   :  { %364 = vmatpush.bf16.msrb.mxu1 %v1474_v62  ;;  %429 = vmatpush.bf16.msrb.mxu2 %v1447_v39 }
  0x4d   :  { %352 = vmatpush.bf16.msrb.mxu0 %v1471_v58  ;;  %444 = vmatpush.bf16.msrb.mxu3 %v1471_v58 }
  0x4e   :  { %365 = vmatpush.bf16.msrb.mxu1 %v1486_v6  ;;  %430 = vmatpush.bf16.msrb.mxu2 %v1457_v48 }
  0x51   :  { %353 = vmatpush.bf16.msrb.mxu0 %v1483_v5  ;;  %445 = vmatpush.bf16.msrb.mxu3 %v1483_v5 }
  0x52   :  { %366 = vmatpush.bf16.msrb.mxu1 %v1494_v13  ;;  %431 = vmatpush.bf16.msrb.mxu2 %v1467_v57 }
  0x55   :  { %451 = vmatpush.bf16.msra.mxu0 %v1424_v18 }
  0x56   :  { %517 = vmatpush.bf16.msra.mxu1 %v1413_v3  ;;  %432 = vmatpush.bf16.msrb.mxu2 %v1477_v2 }
  0x59   :  { %452 = vmatpush.bf16.msra.mxu0 %v1434_v26 }
  0x5a   :  { %530 = vmatpush.bf16.msra.mxu2 %v1415_v7  ;;  %518 = vmatpush.bf16.msra.mxu1 %v1418_v10 }
  0x5d   :  { %453 = vmatpush.bf16.msra.mxu0 %v1444_v35 }
  0x5e   :  { %531 = vmatpush.bf16.msra.mxu2 %v1422_v11  ;;  %519 = vmatpush.bf16.msra.mxu1 %v1427_v19 }
  0x61   :  { %454 = vmatpush.bf16.msra.mxu0 %v1454_v44 }
  0x62   :  { %532 = vmatpush.bf16.msra.mxu2 %v1431_v22  ;;  %520 = vmatpush.bf16.msra.mxu1 %v1437_v30 }
  0x65   :  { %455 = vmatpush.bf16.msra.mxu0 %v1464_v53 }
  0x66   :  { %533 = vmatpush.bf16.msra.mxu2 %v1441_v31  ;;  %521 = vmatpush.bf16.msra.mxu1 %v1447_v39 }
  0x69   :  { %456 = vmatpush.bf16.msra.mxu0 %v1474_v62 }
  0x6a   :  { %534 = vmatpush.bf16.msra.mxu2 %v1451_v41  ;;  %522 = vmatpush.bf16.msra.mxu1 %v1457_v48 }
  0x6d   :  { %457 = vmatpush.bf16.msra.mxu0 %v1486_v6 }
  0x6e   :  { %535 = vmatpush.bf16.msra.mxu2 %v1461_v49  ;;  %523 = vmatpush.bf16.msra.mxu1 %v1467_v57 }
  0x71   :  { %458 = vmatpush.bf16.msra.mxu0 %v1494_v13 }
  0x72   :  { %536 = vmatpush.bf16.msra.mxu2 %v1471_v58  ;;  %524 = vmatpush.bf16.msra.mxu1 %v1477_v2 }
  0x76   :  { %537 = vmatpush.bf16.msra.mxu2 %v1483_v5 }
  0xb1   :  { %v250_v16 = vpop.f32.mrf.mxu0 }
  0xb2   :  { %v280_v17 = vadd.f32 %v250_v16, %v109_v14 }
  0xb4   :  { %v263_v20 = vpop.f32.mrf.mxu1  ;;  %v1108_v23 = vmul.f32 -1.442695, %v280_v17 }
  0xb5   :  { %v281_v21 = vadd.f32 %v263_v20, %v110_v15 }
  0xb6   :  { %1156 = vpow2.f32 %v1108_v23 }
  0xb7   :  { %v1109_v24 = vmul.f32 -1.442695, %v281_v21 }
  0xb9   :  { %1158 = vpow2.f32 %v1109_v24  ;;  %v252_v25 = vpop.f32.mrf.mxu0 }
  0xbc   :  { %v265_v27 = vpop.f32.mrf.mxu1  ;;  %v1157_v28 = vpop.eup %1156 }
  0xbd   :  { %v288_v33 = vadd.f32 1.0, %v1157_v28 }
  0xbe   :  { %v276_v29 = vpop.f32.mrf.mxu2 }
  0xbf   :  { %v1159_v32 = vpop.eup %1158  ;;  %1160 = vrcp.f32 %v288_v33  ;;  %v301_v47 = vand.u32 2147483648, %v288_v33  ;;  %v299_v51 = vand.u32 2147483647, %v288_v33  ;;  %vm295_vm1 = vweird.f32 %v288_v33 }
  0xc0   :  { %v289_v34 = vadd.f32 1.0, %v1159_v32  ;;  %v320_v55 = vadd.f32 %v1556_v43, %v276_v29  ;;  %v329_v32 = vld [vmem:[#allocation3 + $0x18] sm:$0xff] }
  0xc1   :  { %v302_v56 = vor.u32 1.1754944e-38, %v301_v47  ;;  %vm300_vm3 = vcmp.eq.f32.partialorder %v299_v51, 8.507059e+37 }
  0xc2   :  { %1162 = vrcp.f32 %v289_v34  ;;  %vm310_vm4 = vweird.f32 %v289_v34  ;;  %v316_v1 = vand.u32 2147483648, %v289_v34  ;;  %v314_v8 = vand.u32 2147483647, %v289_v34 }
  0xc4   :  { %v317_v14 = vor.u32 1.1754944e-38, %v316_v1  ;;  %vm315_vm7 = vcmp.eq.f32.partialorder %v314_v8, 8.507059e+37 }
  0xc5   :  { %v1161_v37 = vpop.eup %1160 }
  0xc6   :  { %v278_v36 = vpop.f32.mrf.mxu2  ;;  %v291_v40 = vmul.f32 %v1161_v37, %v288_v33  ;;  %vm296_vm0 = vweird.f32 %v1161_v37 }
  0xc7   :  { %vm297_vm2 = vmor %vm295_vm1, %vm296_vm0 }
  0xc8   :  { %v1163_v38 = vpop.eup %1162  ;;  %v292_v45 = vsub.f32 1.0, %v291_v40 }
  0xc9   :  { %v306_v42 = vmul.f32 %v1163_v38, %v289_v34  ;;  %vm311_vm5 = vweird.f32 %v1163_v38 }
  0xca   :  { %v293_v50 = vmul.f32 %v1161_v37, %v292_v45  ;;  %vm312_vm6 = vmor %vm310_vm4, %vm311_vm5 }
  0xcb   :  { %v307_v46 = vsub.f32 1.0, %v306_v42 }
  0xcc   :  { %v294_v54 = vadd.f32 %v1161_v37, %v293_v50 }
  0xcd   :  { %v308_v52 = vmul.f32 %v1163_v38, %v307_v46 }
  0xce   :  { %v298_v59 = vsel %vm297_vm2, %v1161_v37, %v294_v54 }
  0xcf   :  { %v303_v61 = vsel %vm300_vm3, %v302_v56, %v298_v59  ;;  %v309_v63 = vadd.f32 %v1163_v38, %v308_v52 }
  0xd0   :  { %v321_v0 = vmul.f32 %v320_v55, %v303_v61 }
  0xd1   :  { %v313_v12 = vsel %vm312_vm6, %v1163_v38, %v309_v63 }
  0xd2   :  { %v322_v9 = vadd.f32 %v321_v0, %v111_v60  ;;  %v318_v15 = vsel %vm315_vm7, %v317_v14, %v313_v12  ;;  %v331_v12 = vld [vmem:[#allocation3 + $0x28] sm:$0xff] }
  0xd3   :  { %v324_v16 = vsub.f32 1.0, %v318_v15  ;;  %v326_v21 = vmul.f32 %v318_v15, %v1479_v4  ;;  %v330_v4 = vld [vmem:[#allocation3 + $0x20] sm:$0xff] }
  0xd4   :  { %1164 = vtanh.f32 %v322_v9 }
  0xda   :  { %v1165_v17 = vpop.eup %1164 }
  0xdb   :  { %v325_v20 = vmul.f32 %v1165_v17, %v324_v16 }
  0xdd   :  { %v1560_v23 = vadd.f32 %v326_v21, %v325_v20 }
  0xdf   :  { %v332_v24 = vpack.c.bf16 %v1560_v23, %v1560_v23 }
  0xe1   :  { %341 = vmatmul.bf16.vlgmr.msra.gmra.mxu3 %v332_v24  ;;  %354 = vmatmul.bf16.vlgmr.msrb.gmra.mxu0 %v332_v24 }
  0xe2   :  { %367 = vmatmul.bf16.vlgmr.msrb.gmra.mxu1 %v332_v24  ;;  %543 = vmatpush.bf16.msra.mxu3 %v1424_v18 }
  0xe3   :  { %609 = vmatpush.bf16.msrb.mxu0 %v1413_v3  ;;  %622 = vmatpush.bf16.msrb.mxu1 %v1415_v7 }
  0xe6   :  { %544 = vmatpush.bf16.msra.mxu3 %v1434_v26 }
  0xe7   :  { %610 = vmatpush.bf16.msrb.mxu0 %v1418_v10  ;;  %623 = vmatpush.bf16.msrb.mxu1 %v1422_v11 }
  0xea   :  { %545 = vmatpush.bf16.msra.mxu3 %v1444_v35 }
  0xeb   :  { %611 = vmatpush.bf16.msrb.mxu0 %v1427_v19  ;;  %624 = vmatpush.bf16.msrb.mxu1 %v1431_v22 }
  0xee   :  { %546 = vmatpush.bf16.msra.mxu3 %v1454_v44 }
  0xef   :  { %612 = vmatpush.bf16.msrb.mxu0 %v1437_v30  ;;  %625 = vmatpush.bf16.msrb.mxu1 %v1441_v31 }
  0xf2   :  { %547 = vmatpush.bf16.msra.mxu3 %v1464_v53 }
  0xf3   :  { %613 = vmatpush.bf16.msrb.mxu0 %v1447_v39  ;;  %626 = vmatpush.bf16.msrb.mxu1 %v1451_v41 }
  0xf6   :  { %548 = vmatpush.bf16.msra.mxu3 %v1474_v62 }
  0xf7   :  { %614 = vmatpush.bf16.msrb.mxu0 %v1457_v48  ;;  %627 = vmatpush.bf16.msrb.mxu1 %v1461_v49 }
  0xfa   :  { %549 = vmatpush.bf16.msra.mxu3 %v1486_v6 }
  0xfb   :  { %615 = vmatpush.bf16.msrb.mxu0 %v1467_v57  ;;  %628 = vmatpush.bf16.msrb.mxu1 %v1471_v58 }
  0xfe   :  { %550 = vmatpush.bf16.msra.mxu3 %v1494_v13 }
  0xff   :  { %616 = vmatpush.bf16.msrb.mxu0 %v1477_v2  ;;  %629 = vmatpush.bf16.msrb.mxu1 %v1483_v5 }
 0x15e   :  { %v355_v25 = vpop.f32.mrf.mxu0 }
 0x15f   :  { %v373_v27 = vadd.f32 %v355_v25, %v330_v4  ;;  %v368_v28 = vpop.f32.mrf.mxu1 }
 0x160   :  { %v412_v8 = vadd.f32 %v1556_v43, %v368_v28 }
 0x161   :  { %v1111_v29 = vmul.f32 -1.442695, %v373_v27 }
 0x163   :  { %1166 = vpow2.f32 %v1111_v29 }
 0x164   :  { %v342_v33 = vpop.f32.mrf.mxu3 }
 0x165   :  { %v372_v34 = vadd.f32 %v342_v33, %v329_v32 }
 0x166   :  { %v357_v36 = vpop.f32.mrf.mxu0 }
 0x167   :  { %v1110_v37 = vmul.f32 -1.442695, %v372_v34  ;;  %v370_v38 = vpop.f32.mrf.mxu1  ;;  %v421_v36 = vld [vmem:[#allocation3 + $0x30] sm:$0xff] }
 0x169   :  { %v1167_v40 = vpop.eup %1166  ;;  %1168 = vpow2.f32 %v1110_v37  ;;  %v422_v37 = vld [vmem:[#allocation3 + $0x38] sm:$0xff] }
 0x16a   :  { %v381_v42 = vadd.f32 1.0, %v1167_v40 }
 0x16c   :  { %v344_v45 = vpop.f32.mrf.mxu3  ;;  %1170 = vrcp.f32 %v381_v42  ;;  %v408_v16 = vand.u32 2147483648, %v381_v42  ;;  %vm402_vm13 = vweird.f32 %v381_v42  ;;  %v406_v20 = vand.u32 2147483647, %v381_v42 }
 0x16e   :  { %v409_v4 = vor.u32 1.1754944e-38, %v408_v16  ;;  %vm407_vm15 = vcmp.eq.f32.partialorder %v406_v20, 8.507059e+37 }
 0x16f   :  { %v1169_v46 = vpop.eup %1168 }
 0x170   :  { %v380_v47 = vadd.f32 1.0, %v1169_v46 }
 0x172   :  { %1172 = vrcp.f32 %v380_v47  ;;  %v1171_v50 = vpop.eup %1170  ;;  %v393_v59 = vand.u32 2147483648, %v380_v47  ;;  %v391_v61 = vand.u32 2147483647, %v380_v47  ;;  %vm387_vm9 = vweird.f32 %v380_v47 }
 0x173   :  { %v398_v51 = vmul.f32 %v1171_v50, %v381_v42  ;;  %vm403_vm12 = vweird.f32 %v1171_v50 }
 0x174   :  { %v394_v1 = vor.u32 1.1754944e-38, %v393_v59  ;;  %vm392_vm11 = vcmp.eq.f32.partialorder %v391_v61, 8.507059e+37  ;;  %vm404_vm14 = vmor %vm402_vm13, %vm403_vm12 }
 0x175   :  { %v399_v55 = vsub.f32 1.0, %v398_v51 }
 0x177   :  { %v400_v63 = vmul.f32 %v1171_v50, %v399_v55 }
 0x178   :  { %v1173_v52 = vpop.eup %1172 }
 0x179   :  { %v383_v54 = vmul.f32 %v1173_v52, %v380_v47  ;;  %vm388_vm8 = vweird.f32 %v1173_v52  ;;  %v401_v15 = vadd.f32 %v1171_v50, %v400_v63 }
 0x17a   :  { %vm389_vm10 = vmor %vm387_vm9, %vm388_vm8 }
 0x17b   :  { %v384_v56 = vsub.f32 1.0, %v383_v54  ;;  %v405_v24 = vsel %vm404_vm14, %v1171_v50, %v401_v15 }
 0x17c   :  { %v410_v25 = vsel %vm407_vm15, %v409_v4, %v405_v24  ;;  %v423_v4 = vld [vmem:[#allocation3 + $0x40] sm:$0xff] }
 0x17d   :  { %v385_v60 = vmul.f32 %v1173_v52, %v384_v56  ;;  %v416_v27 = vsub.f32 1.0, %v410_v25  ;;  %v418_v32 = vmul.f32 %v410_v25, %v1560_v23 }
 0x17f   :  { %v386_v0 = vadd.f32 %v1173_v52, %v385_v60 }
 0x181   :  { %v390_v9 = vsel %vm389_vm10, %v1173_v52, %v386_v0 }
 0x182   :  { %v395_v14 = vsel %vm392_vm11, %v394_v1, %v390_v9 }
 0x183   :  { %v413_v17 = vmul.f32 %v412_v8, %v395_v14 }
 0x185   :  { %v414_v21 = vadd.f32 %v413_v17, %v331_v12 }
 0x187   :  { %1174 = vtanh.f32 %v414_v21 }
 0x18d   :  { %v1175_v29 = vpop.eup %1174 }
 0x18e   :  { %v417_v28 = vmul.f32 %v1175_v29, %v416_v27 }
 0x190   :  { %v1590_v33 = vadd.f32 %v418_v32, %v417_v28 }
 0x192   :  { %v424_v34 = vpack.c.bf16 %v1590_v33, %v1590_v33 }
 0x194   :  { %433 = vmatmul.bf16.vlgmr.msrb.gmra.mxu2 %v424_v34  ;;  %446 = vmatmul.bf16.vlgmr.msrb.gmra.mxu3 %v424_v34 }
 0x195   :  { %459 = vmatmul.bf16.vlgmr.msra.gmra.mxu0 %v424_v34  ;;  %635 = vmatpush.bf16.msrb.mxu2 %v1424_v18 }
 0x196   :  { %701 = vmatpush.bf16.msrb.mxu3 %v1413_v3  ;;  %714 = vmatpush.bf16.msra.mxu0 %v1415_v7 }
 0x199   :  { %636 = vmatpush.bf16.msrb.mxu2 %v1434_v26 }
 0x19a   :  { %702 = vmatpush.bf16.msrb.mxu3 %v1418_v10  ;;  %715 = vmatpush.bf16.msra.mxu0 %v1422_v11 }
 0x19d   :  { %637 = vmatpush.bf16.msrb.mxu2 %v1444_v35 }
 0x19e   :  { %703 = vmatpush.bf16.msrb.mxu3 %v1427_v19  ;;  %716 = vmatpush.bf16.msra.mxu0 %v1431_v22 }
 0x1a1   :  { %638 = vmatpush.bf16.msrb.mxu2 %v1454_v44 }
 0x1a2   :  { %704 = vmatpush.bf16.msrb.mxu3 %v1437_v30  ;;  %717 = vmatpush.bf16.msra.mxu0 %v1441_v31 }
 0x1a5   :  { %639 = vmatpush.bf16.msrb.mxu2 %v1464_v53 }
 0x1a6   :  { %705 = vmatpush.bf16.msrb.mxu3 %v1447_v39  ;;  %718 = vmatpush.bf16.msra.mxu0 %v1451_v41 }
 0x1a9   :  { %640 = vmatpush.bf16.msrb.mxu2 %v1474_v62 }
 0x1aa   :  { %706 = vmatpush.bf16.msrb.mxu3 %v1457_v48  ;;  %719 = vmatpush.bf16.msra.mxu0 %v1461_v49 }
 0x1ad   :  { %641 = vmatpush.bf16.msrb.mxu2 %v1486_v6 }
 0x1ae   :  { %707 = vmatpush.bf16.msrb.mxu3 %v1467_v57  ;;  %720 = vmatpush.bf16.msra.mxu0 %v1471_v58 }
 0x1b1   :  { %642 = vmatpush.bf16.msrb.mxu2 %v1494_v13 }
 0x1b2   :  { %708 = vmatpush.bf16.msrb.mxu3 %v1477_v2  ;;  %721 = vmatpush.bf16.msra.mxu0 %v1483_v5 }
 0x212   :  { %v460_v23 = vpop.f32.mrf.mxu0 }
 0x213   :  { %v504_v20 = vadd.f32 %v1556_v43, %v460_v23 }
 0x217   :  { %v434_v38 = vpop.f32.mrf.mxu2  ;;  %v447_v40 = vpop.f32.mrf.mxu3 }
 0x218   :  { %v464_v42 = vadd.f32 %v434_v38, %v421_v36  ;;  %v465_v45 = vadd.f32 %v447_v40, %v422_v37 }
 0x21a   :  { %v1112_v46 = vmul.f32 -1.442695, %v464_v42  ;;  %v1113_v47 = vmul.f32 -1.442695, %v465_v45  ;;  %v462_v50 = vpop.f32.mrf.mxu0 }
 0x21c   :  { %1176 = vpow2.f32 %v1112_v46 }
 0x21d   :  { %1178 = vpow2.f32 %v1113_v47 }
 0x21f   :  { %v436_v51 = vpop.f32.mrf.mxu2  ;;  %v449_v52 = vpop.f32.mrf.mxu3 }
 0x220   :  { %v514_v52 = vld [vmem:[#allocation3 + $0x50] sm:$0xff] }
 0x222   :  { %v1177_v54 = vpop.eup %1176 }
 0x223   :  { %v1179_v55 = vpop.eup %1178  ;;  %v472_v56 = vadd.f32 1.0, %v1177_v54 }
 0x224   :  { %v473_v59 = vadd.f32 1.0, %v1179_v55 }
 0x225   :  { %1180 = vrcp.f32 %v472_v56  ;;  %v485_v8 = vand.u32 2147483648, %v472_v56  ;;  %v483_v14 = vand.u32 2147483647, %v472_v56  ;;  %vm479_vm1 = vweird.f32 %v472_v56 }
 0x226   :  { %1182 = vrcp.f32 %v473_v59  ;;  %v500_v29 = vand.u32 2147483648, %v473_v59  ;;  %vm494_vm5 = vweird.f32 %v473_v59  ;;  %v498_v28 = vand.u32 2147483647, %v473_v59 }
 0x227   :  { %v486_v17 = vor.u32 1.1754944e-38, %v485_v8  ;;  %vm484_vm3 = vcmp.eq.f32.partialorder %v483_v14, 8.507059e+37 }
 0x228   :  { %v501_v36 = vor.u32 1.1754944e-38, %v500_v29  ;;  %vm499_vm7 = vcmp.eq.f32.partialorder %v498_v28, 8.507059e+37 }
 0x22b   :  { %v1181_v60 = vpop.eup %1180 }
 0x22c   :  { %v1183_v61 = vpop.eup %1182  ;;  %v475_v63 = vmul.f32 %v1181_v60, %v472_v56  ;;  %vm480_vm0 = vweird.f32 %v1181_v60 }
 0x22d   :  { %v490_v0 = vmul.f32 %v1183_v61, %v473_v59  ;;  %vm481_vm2 = vmor %vm479_vm1, %vm480_vm0  ;;  %vm495_vm4 = vweird.f32 %v1183_v61 }
 0x22e   :  { %v476_v1 = vsub.f32 1.0, %v475_v63  ;;  %vm496_vm6 = vmor %vm494_vm5, %vm495_vm4 }
 0x22f   :  { %v491_v9 = vsub.f32 1.0, %v490_v0 }
 0x230   :  { %v477_v12 = vmul.f32 %v1181_v60, %v476_v1 }
 0x231   :  { %v492_v15 = vmul.f32 %v1183_v61, %v491_v9 }
 0x232   :  { %v478_v16 = vadd.f32 %v1181_v60, %v477_v12 }
 0x233   :  { %v493_v25 = vadd.f32 %v1183_v61, %v492_v15 }
 0x234   :  { %v482_v21 = vsel %vm481_vm2, %v1181_v60, %v478_v16 }
 0x235   :  { %v487_v24 = vsel %vm484_vm3, %v486_v17, %v482_v21  ;;  %v497_v34 = vsel %vm496_vm6, %v1183_v61, %v493_v25 }
 0x236   :  { %v505_v27 = vmul.f32 %v504_v20, %v487_v24  ;;  %v502_v37 = vsel %vm499_vm7, %v501_v36, %v497_v34 }
 0x237   :  { %v508_v38 = vsub.f32 1.0, %v502_v37  ;;  %v510_v42 = vmul.f32 %v502_v37, %v1590_v33  ;;  %v513_v33 = vld [vmem:[#allocation3 + $0x48] sm:$0xff] }
 0x238   :  { %v506_v32 = vadd.f32 %v505_v27, %v423_v4 }
 0x23a   :  { %1184 = vtanh.f32 %v506_v32  ;;  %v515_v32 = vld [vmem:[#allocation3 + $0x58] sm:$0xff] }
 0x240   :  { %v1185_v40 = vpop.eup %1184 }
 0x241   :  { %v509_v23 = vmul.f32 %v1185_v40, %v508_v38 }
 0x243   :  { %v1620_v45 = vadd.f32 %v510_v42, %v509_v23 }
 0x245   :  { %v516_v46 = vpack.c.bf16 %v1620_v45, %v1620_v45 }
 0x247   :  { %525 = vmatmul.bf16.vlgmr.msra.gmra.mxu1 %v516_v46  ;;  %538 = vmatmul.bf16.vlgmr.msra.gmra.mxu2 %v516_v46 }
 0x248   :  { %551 = vmatmul.bf16.vlgmr.msra.gmra.mxu3 %v516_v46  ;;  %727 = vmatpush.bf16.msra.mxu1 %v1424_v18 }
 0x249   :  { %793 = vmatpush.bf16.msra.mxu2 %v1413_v3  ;;  %806 = vmatpush.bf16.msra.mxu3 %v1415_v7 }
 0x24c   :  { %728 = vmatpush.bf16.msra.mxu1 %v1434_v26 }
 0x24d   :  { %794 = vmatpush.bf16.msra.mxu2 %v1418_v10  ;;  %807 = vmatpush.bf16.msra.mxu3 %v1422_v11 }
 0x250   :  { %729 = vmatpush.bf16.msra.mxu1 %v1444_v35 }
 0x251   :  { %795 = vmatpush.bf16.msra.mxu2 %v1427_v19  ;;  %808 = vmatpush.bf16.msra.mxu3 %v1431_v22 }
 0x254   :  { %730 = vmatpush.bf16.msra.mxu1 %v1454_v44 }
 0x255   :  { %796 = vmatpush.bf16.msra.mxu2 %v1437_v30  ;;  %809 = vmatpush.bf16.msra.mxu3 %v1441_v31 }
 0x258   :  { %731 = vmatpush.bf16.msra.mxu1 %v1464_v53 }
 0x259   :  { %797 = vmatpush.bf16.msra.mxu2 %v1447_v39  ;;  %810 = vmatpush.bf16.msra.mxu3 %v1451_v41 }
 0x25c   :  { %732 = vmatpush.bf16.msra.mxu1 %v1474_v62 }
 0x25d   :  { %798 = vmatpush.bf16.msra.mxu2 %v1457_v48  ;;  %811 = vmatpush.bf16.msra.mxu3 %v1461_v49 }
 0x260   :  { %733 = vmatpush.bf16.msra.mxu1 %v1486_v6 }
 0x261   :  { %799 = vmatpush.bf16.msra.mxu2 %v1467_v57  ;;  %812 = vmatpush.bf16.msra.mxu3 %v1471_v58 }
 0x264   :  { %734 = vmatpush.bf16.msra.mxu1 %v1494_v13 }
 0x265   :  { %800 = vmatpush.bf16.msra.mxu2 %v1477_v2  ;;  %813 = vmatpush.bf16.msra.mxu3 %v1483_v5 }
 0x2c4   :  { %v526_v47 = vpop.f32.mrf.mxu1 }
 0x2c5   :  { %v556_v50 = vadd.f32 %v526_v47, %v513_v33 }
 0x2c7   :  { %v1114_v51 = vmul.f32 -1.442695, %v556_v50 }
 0x2c9   :  { %1186 = vpow2.f32 %v1114_v51 }
 0x2ca   :  { %v539_v54 = vpop.f32.mrf.mxu2 }
 0x2cb   :  { %v557_v55 = vadd.f32 %v539_v54, %v514_v52  ;;  %v552_v56 = vpop.f32.mrf.mxu3 }
 0x2cc   :  { %v528_v59 = vpop.f32.mrf.mxu1  ;;  %v596_v28 = vadd.f32 %v1556_v43, %v552_v56 }
 0x2cd   :  { %v1115_v60 = vmul.f32 -1.442695, %v557_v55 }
 0x2cf   :  { %v1187_v61 = vpop.eup %1186  ;;  %1188 = vpow2.f32 %v1115_v60 }
 0x2d0   :  { %v564_v63 = vadd.f32 1.0, %v1187_v61 }
 0x2d2   :  { %1190 = vrcp.f32 %v564_v63  ;;  %v541_v0 = vpop.f32.mrf.mxu2  ;;  %v577_v16 = vand.u32 2147483648, %v564_v63  ;;  %v575_v20 = vand.u32 2147483647, %v564_v63  ;;  %vm571_vm9 = vweird.f32 %v564_v63 }
 0x2d3   :  { %v554_v1 = vpop.f32.mrf.mxu3 }
 0x2d4   :  { %v578_v25 = vor.u32 1.1754944e-38, %v577_v16  ;;  %vm576_vm11 = vcmp.eq.f32.partialorder %v575_v20, 8.507059e+37  ;;  %v607_v20 = vld [vmem:[#allocation3 + $0x70] sm:$0xff] }
 0x2d5   :  { %v1189_v8 = vpop.eup %1188 }
 0x2d6   :  { %v565_v9 = vadd.f32 1.0, %v1189_v8 }
 0x2d8   :  { %v1191_v12 = vpop.eup %1190  ;;  %1192 = vrcp.f32 %v565_v9  ;;  %v592_v37 = vand.u32 2147483648, %v565_v9  ;;  %v590_v40 = vand.u32 2147483647, %v565_v9  ;;  %vm586_vm13 = vweird.f32 %v565_v9 }
 0x2d9   :  { %v567_v14 = vmul.f32 %v1191_v12, %v564_v63  ;;  %vm572_vm8 = vweird.f32 %v1191_v12 }
 0x2da   :  { %vm573_vm10 = vmor %vm571_vm9, %vm572_vm8  ;;  %v593_v46 = vor.u32 1.1754944e-38, %v592_v37  ;;  %vm591_vm15 = vcmp.eq.f32.partialorder %v590_v40, 8.507059e+37 }
 0x2db   :  { %v568_v15 = vsub.f32 1.0, %v567_v14 }
 0x2dd   :  { %v569_v17 = vmul.f32 %v1191_v12, %v568_v15 }
 0x2de   :  { %v1193_v21 = vpop.eup %1192 }
 0x2df   :  { %v582_v24 = vmul.f32 %v1193_v21, %v565_v9  ;;  %v570_v4 = vadd.f32 %v1191_v12, %v569_v17  ;;  %vm587_vm12 = vweird.f32 %v1193_v21 }
 0x2e0   :  { %vm588_vm14 = vmor %vm586_vm13, %vm587_vm12 }
 0x2e1   :  { %v583_v27 = vsub.f32 1.0, %v582_v24  ;;  %v574_v29 = vsel %vm573_vm10, %v1191_v12, %v570_v4 }
 0x2e2   :  { %v579_v34 = vsel %vm576_vm11, %v578_v25, %v574_v29 }
 0x2e3   :  { %v584_v36 = vmul.f32 %v1193_v21, %v583_v27  ;;  %v597_v38 = vmul.f32 %v596_v28, %v579_v34 }
 0x2e5   :  { %v598_v23 = vadd.f32 %v597_v38, %v515_v32  ;;  %v585_v42 = vadd.f32 %v1193_v21, %v584_v36 }
 0x2e7   :  { %1194 = vtanh.f32 %v598_v23  ;;  %v589_v33 = vsel %vm588_vm14, %v1193_v21, %v585_v42 }
 0x2e8   :  { %v594_v47 = vsel %vm591_vm15, %v593_v46, %v589_v33  ;;  %v698_v46 = vld [vmem:[#allocation3 + $0x80] sm:$0xff] }
 0x2e9   :  { %v600_v50 = vsub.f32 1.0, %v594_v47  ;;  %v602_v54 = vmul.f32 %v594_v47, %v1620_v45 }
 0x2ed   :  { %v1195_v51 = vpop.eup %1194 }
 0x2ee   :  { %v601_v52 = vmul.f32 %v1195_v51, %v600_v50 }
 0x2f0   :  { %v1650_v55 = vadd.f32 %v602_v54, %v601_v52 }
 0x2f2   :  { %v608_v56 = vpack.c.bf16 %v1650_v55, %v1650_v55 }
 0x2f4   :  { %617 = vmatmul.bf16.vlgmr.msrb.gmra.mxu0 %v608_v56  ;;  %630 = vmatmul.bf16.vlgmr.msrb.gmra.mxu1 %v608_v56 }
 0x2f5   :  { %643 = vmatmul.bf16.vlgmr.msrb.gmra.mxu2 %v608_v56  ;;  %819 = vmatpush.bf16.msrb.mxu0 %v1424_v18 }
 0x2f6   :  { %885 = vmatpush.bf16.msrb.mxu1 %v1413_v3  ;;  %898 = vmatpush.bf16.msrb.mxu2 %v1415_v7  ;;  %v605_v3 = vld [vmem:[#allocation3 + $0x60] sm:$0xff]  ;;  %v606_v7 = vld [vmem:[#allocation3 + $0x68] sm:$0xff] }
 0x2f9   :  { %820 = vmatpush.bf16.msrb.mxu0 %v1434_v26 }
 0x2fa   :  { %886 = vmatpush.bf16.msrb.mxu1 %v1418_v10  ;;  %899 = vmatpush.bf16.msrb.mxu2 %v1422_v11 }
 0x2fd   :  { %821 = vmatpush.bf16.msrb.mxu0 %v1444_v35 }
 0x2fe   :  { %887 = vmatpush.bf16.msrb.mxu1 %v1427_v19  ;;  %900 = vmatpush.bf16.msrb.mxu2 %v1431_v22 }
 0x301   :  { %822 = vmatpush.bf16.msrb.mxu0 %v1454_v44 }
 0x302   :  { %888 = vmatpush.bf16.msrb.mxu1 %v1437_v30  ;;  %901 = vmatpush.bf16.msrb.mxu2 %v1441_v31 }
 0x305   :  { %823 = vmatpush.bf16.msrb.mxu0 %v1464_v53 }
 0x306   :  { %889 = vmatpush.bf16.msrb.mxu1 %v1447_v39  ;;  %902 = vmatpush.bf16.msrb.mxu2 %v1451_v41 }
 0x309   :  { %824 = vmatpush.bf16.msrb.mxu0 %v1474_v62 }
 0x30a   :  { %890 = vmatpush.bf16.msrb.mxu1 %v1457_v48  ;;  %903 = vmatpush.bf16.msrb.mxu2 %v1461_v49 }
 0x30d   :  { %825 = vmatpush.bf16.msrb.mxu0 %v1486_v6 }
 0x30e   :  { %891 = vmatpush.bf16.msrb.mxu1 %v1467_v57  ;;  %904 = vmatpush.bf16.msrb.mxu2 %v1471_v58 }
 0x311   :  { %826 = vmatpush.bf16.msrb.mxu0 %v1494_v13 }
 0x312   :  { %892 = vmatpush.bf16.msrb.mxu1 %v1477_v2  ;;  %905 = vmatpush.bf16.msrb.mxu2 %v1483_v5 }
 0x371   :  { %v618_v10 = vpop.f32.mrf.mxu0  ;;  %v631_v11 = vpop.f32.mrf.mxu1 }
 0x372   :  { %v648_v19 = vadd.f32 %v618_v10, %v605_v3  ;;  %v649_v22 = vadd.f32 %v631_v11, %v606_v7 }
 0x374   :  { %v1116_v30 = vmul.f32 -1.442695, %v648_v19  ;;  %v1117_v31 = vmul.f32 -1.442695, %v649_v22 }
 0x376   :  { %1196 = vpow2.f32 %v1116_v30 }
 0x377   :  { %1198 = vpow2.f32 %v1117_v31 }
 0x378   :  { %v644_v39 = vpop.f32.mrf.mxu2 }
 0x379   :  { %v620_v41 = vpop.f32.mrf.mxu0  ;;  %v633_v48 = vpop.f32.mrf.mxu1  ;;  %v688_v17 = vadd.f32 %v1556_v43, %v644_v39 }
 0x37c   :  { %v1197_v49 = vpop.eup %1196 }
 0x37d   :  { %v1199_v57 = vpop.eup %1198  ;;  %v656_v58 = vadd.f32 1.0, %v1197_v49 }
 0x37e   :  { %v657_v45 = vadd.f32 1.0, %v1199_v57 }
 0x37f   :  { %1200 = vrcp.f32 %v656_v58  ;;  %v669_v1 = vand.u32 2147483648, %v656_v58  ;;  %v667_v9 = vand.u32 2147483647, %v656_v58  ;;  %vm663_vm1 = vweird.f32 %v656_v58 }
 0x380   :  { %1202 = vrcp.f32 %v657_v45  ;;  %v646_v2 = vpop.f32.mrf.mxu2  ;;  %v684_v4 = vand.u32 2147483648, %v657_v45  ;;  %vm678_vm5 = vweird.f32 %v657_v45  ;;  %v682_v27 = vand.u32 2147483647, %v657_v45 }
 0x381   :  { %v670_v15 = vor.u32 1.1754944e-38, %v669_v1  ;;  %vm668_vm3 = vcmp.eq.f32.partialorder %v667_v9, 8.507059e+37 }
 0x382   :  { %v685_v32 = vor.u32 1.1754944e-38, %v684_v4  ;;  %vm683_vm7 = vcmp.eq.f32.partialorder %v682_v27, 8.507059e+37 }
 0x385   :  { %v1201_v5 = vpop.eup %1200 }
 0x386   :  { %v1203_v59 = vpop.eup %1202  ;;  %v659_v60 = vmul.f32 %v1201_v5, %v656_v58  ;;  %vm664_vm0 = vweird.f32 %v1201_v5 }
 0x387   :  { %v674_v61 = vmul.f32 %v1203_v59, %v657_v45  ;;  %vm665_vm2 = vmor %vm663_vm1, %vm664_vm0  ;;  %vm679_vm4 = vweird.f32 %v1203_v59  ;;  %v699_v45 = vld [vmem:[#allocation3 + $0x88] sm:$0xff] }
 0x388   :  { %v660_v63 = vsub.f32 1.0, %v659_v60  ;;  %vm680_vm6 = vmor %vm678_vm5, %vm679_vm4 }
 0x389   :  { %v675_v0 = vsub.f32 1.0, %v674_v61 }
 0x38a   :  { %v661_v8 = vmul.f32 %v1201_v5, %v660_v63 }
 0x38b   :  { %v676_v12 = vmul.f32 %v1203_v59, %v675_v0 }
 0x38c   :  { %v662_v14 = vadd.f32 %v1201_v5, %v661_v8 }
 0x38d   :  { %v677_v24 = vadd.f32 %v1203_v59, %v676_v12 }
 0x38e   :  { %v666_v16 = vsel %vm665_vm2, %v1201_v5, %v662_v14 }
 0x38f   :  { %v671_v21 = vsel %vm668_vm3, %v670_v15, %v666_v16  ;;  %v681_v28 = vsel %vm680_vm6, %v1203_v59, %v677_v24 }
 0x390   :  { %v689_v25 = vmul.f32 %v688_v17, %v671_v21  ;;  %v686_v34 = vsel %vm683_vm7, %v685_v32, %v681_v28  ;;  %v790_v21 = vld [vmem:[#allocation3 + $0x98] sm:$0xff] }
 0x391   :  { %v692_v36 = vsub.f32 1.0, %v686_v34  ;;  %v694_v40 = vmul.f32 %v686_v34, %v1650_v55 }
 0x392   :  { %v690_v29 = vadd.f32 %v689_v25, %v607_v20  ;;  %v789_v20 = vld [vmem:[#allocation3 + $0x90] sm:$0xff] }
 0x394   :  { %1204 = vtanh.f32 %v690_v29 }
 0x39a   :  { %v1205_v37 = vpop.eup %1204 }
 0x39b   :  { %v693_v38 = vmul.f32 %v1205_v37, %v692_v36 }
 0x39d   :  { %v1680_v23 = vadd.f32 %v694_v40, %v693_v38 }
 0x39f   :  { %v700_v42 = vpack.c.bf16 %v1680_v23, %v1680_v23 }
 0x3a1   :  { %709 = vmatmul.bf16.vlgmr.msrb.gmra.mxu3 %v700_v42  ;;  %722 = vmatmul.bf16.vlgmr.msra.gmra.mxu0 %v700_v42 }
 0x3a2   :  { %735 = vmatmul.bf16.vlgmr.msra.gmra.mxu1 %v700_v42  ;;  %911 = vmatpush.bf16.msrb.mxu3 %v1424_v18  ;;  %v697_v18 = vld [vmem:[#allocation3 + $0x78] sm:$0xff] }
 0x3a6   :  { %912 = vmatpush.bf16.msrb.mxu3 %v1434_v26 }
 0x3aa   :  { %913 = vmatpush.bf16.msrb.mxu3 %v1444_v35 }
 0x3ae   :  { %914 = vmatpush.bf16.msrb.mxu3 %v1454_v44 }
 0x3b2   :  { %915 = vmatpush.bf16.msrb.mxu3 %v1464_v53 }
 0x3b6   :  { %916 = vmatpush.bf16.msrb.mxu3 %v1474_v62 }
 0x3ba   :  { %917 = vmatpush.bf16.msrb.mxu3 %v1486_v6 }
 0x3be   :  { %918 = vmatpush.bf16.msrb.mxu3 %v1494_v13 }
 0x41e   :  { %v723_v33 = vpop.f32.mrf.mxu0 }
 0x41f   :  { %v741_v47 = vadd.f32 %v723_v33, %v698_v46  ;;  %v736_v50 = vpop.f32.mrf.mxu1 }
 0x420   :  { %v780_v49 = vadd.f32 %v1556_v43, %v736_v50 }
 0x421   :  { %v1119_v51 = vmul.f32 -1.442695, %v741_v47 }
 0x423   :  { %1206 = vpow2.f32 %v1119_v51 }
 0x424   :  { %v710_v26 = vpop.f32.mrf.mxu3 }
 0x425   :  { %v740_v52 = vadd.f32 %v710_v26, %v697_v18 }
 0x426   :  { %v725_v35 = vpop.f32.mrf.mxu0 }
 0x427   :  { %v1118_v54 = vmul.f32 -1.442695, %v740_v52  ;;  %v738_v44 = vpop.f32.mrf.mxu1 }
 0x429   :  { %v1207_v55 = vpop.eup %1206  ;;  %1208 = vpow2.f32 %v1118_v54 }
 0x42a   :  { %v749_v53 = vadd.f32 1.0, %v1207_v55 }
 0x42c   :  { %v712_v62 = vpop.f32.mrf.mxu3  ;;  %1210 = vrcp.f32 %v749_v53  ;;  %v776_v5 = vand.u32 2147483648, %v749_v53  ;;  %vm770_vm13 = vweird.f32 %v749_v53  ;;  %v774_v60 = vand.u32 2147483647, %v749_v53 }
 0x42e   :  { %v777_v0 = vor.u32 1.1754944e-38, %v776_v5  ;;  %vm775_vm15 = vcmp.eq.f32.partialorder %v774_v60, 8.507059e+37 }
 0x42f   :  { %v1209_v6 = vpop.eup %1208 }
 0x430   :  { %v748_v56 = vadd.f32 1.0, %v1209_v6  ;;  %v791_v6 = vld [vmem:[#allocation3 + $0xa0] sm:$0xff] }
 0x432   :  { %1212 = vrcp.f32 %v748_v56  ;;  %v1211_v13 = vpop.eup %1210  ;;  %v761_v22 = vand.u32 2147483648, %v748_v56  ;;  %v759_v31 = vand.u32 2147483647, %v748_v56  ;;  %vm755_vm9 = vweird.f32 %v748_v56 }
 0x433   :  { %v766_v3 = vmul.f32 %v1211_v13, %v749_v53  ;;  %vm771_vm12 = vweird.f32 %v1211_v13 }
 0x434   :  { %v762_v48 = vor.u32 1.1754944e-38, %v761_v22  ;;  %vm760_vm11 = vcmp.eq.f32.partialorder %v759_v31, 8.507059e+37  ;;  %vm772_vm14 = vmor %vm770_vm13, %vm771_vm12 }
 0x435   :  { %v767_v11 = vsub.f32 1.0, %v766_v3 }
 0x437   :  { %v768_v39 = vmul.f32 %v1211_v13, %v767_v11 }
 0x438   :  { %v1213_v7 = vpop.eup %1212 }
 0x439   :  { %v751_v10 = vmul.f32 %v1213_v7, %v748_v56  ;;  %vm756_vm8 = vweird.f32 %v1213_v7  ;;  %v769_v2 = vadd.f32 %v1211_v13, %v768_v39 }
 0x43a   :  { %vm757_vm10 = vmor %vm755_vm9, %vm756_vm8 }
 0x43b   :  { %v752_v19 = vsub.f32 1.0, %v751_v10  ;;  %v773_v63 = vsel %vm772_vm14, %v1211_v13, %v769_v2  ;;  %v882_v2 = vld [vmem:[#allocation3 + $0xb0] sm:$0xff] }
 0x43c   :  { %v778_v1 = vsel %vm775_vm15, %v777_v0, %v773_v63 }
 0x43d   :  { %v753_v30 = vmul.f32 %v1213_v7, %v752_v19  ;;  %v784_v8 = vsub.f32 1.0, %v778_v1  ;;  %v786_v14 = vmul.f32 %v778_v1, %v1680_v23 }
 0x43f   :  { %v754_v41 = vadd.f32 %v1213_v7, %v753_v30 }
 0x441   :  { %v758_v57 = vsel %vm757_vm10, %v1213_v7, %v754_v41 }
 0x442   :  { %v763_v58 = vsel %vm760_vm11, %v762_v48, %v758_v57 }
 0x443   :  { %v781_v59 = vmul.f32 %v780_v49, %v763_v58  ;;  %v881_v49 = vld [vmem:[#allocation3 + $0xa8] sm:$0xff] }
 0x445   :  { %v782_v61 = vadd.f32 %v781_v59, %v699_v45 }
 0x447   :  { %1214 = vtanh.f32 %v782_v61 }
 0x44d   :  { %v1215_v9 = vpop.eup %1214 }
 0x44e   :  { %v785_v12 = vmul.f32 %v1215_v9, %v784_v8 }
 0x450   :  { %v787_v15 = vadd.f32 %v786_v14, %v785_v12 }
 0x452   :  { %v792_v16 = vpack.c.bf16 %v787_v15, %v787_v15 }
 0x454   :  { %801 = vmatmul.bf16.vlgmr.msra.gmra.mxu2 %v792_v16  ;;  %814 = vmatmul.bf16.vlgmr.msra.gmra.mxu3 %v792_v16 }
 0x455   :  { %827 = vmatmul.bf16.vlgmr.msrb.gmra.mxu0 %v792_v16 }
 0x4d2   :  { %v828_v17 = vpop.f32.mrf.mxu0 }
 0x4d3   :  { %v872_v55 = vadd.f32 %v1556_v43, %v828_v17 }
 0x4d7   :  { %v802_v24 = vpop.f32.mrf.mxu2  ;;  %v815_v4 = vpop.f32.mrf.mxu3 }
 0x4d8   :  { %v832_v25 = vadd.f32 %v802_v24, %v789_v20  ;;  %v833_v27 = vadd.f32 %v815_v4, %v790_v21 }
 0x4da   :  { %v1120_v29 = vmul.f32 -1.442695, %v832_v25  ;;  %v1121_v28 = vmul.f32 -1.442695, %v833_v27  ;;  %v830_v32 = vpop.f32.mrf.mxu0 }
 0x4dc   :  { %1216 = vpow2.f32 %v1120_v29 }
 0x4dd   :  { %1218 = vpow2.f32 %v1121_v28 }
 0x4df   :  { %v804_v34 = vpop.f32.mrf.mxu2  ;;  %v817_v36 = vpop.f32.mrf.mxu3 }
 0x4e0   :  { %v1236_v34 = vld [vmem:[%s1711_s2] ss:$0 sm:$0xff]  ;;  %s1372_s2 = smov [#allocation9]  }
 0x4e1   :  { %s994_s11 = sshll.u32 %s1372_s2, 4  ;;  %s995_s11 = int_to_ptr.vmem [resolvable:$true] %s994_s11 }
 0x4e2   :  { %v1217_v37 = vpop.eup %1216 }
 0x4e3   :  { %v1219_v38 = vpop.eup %1218  ;;  %v840_v40 = vadd.f32 1.0, %v1217_v37  ;;  %v883_v37 = vld [vmem:[#allocation3 + $0xb8] sm:$0xff] }
 0x4e4   :  { %v841_v23 = vadd.f32 1.0, %v1219_v38 }
 0x4e5   :  { %1220 = vrcp.f32 %v840_v40  ;;  %v853_v51 = vand.u32 2147483648, %v840_v40  ;;  %v851_v52 = vand.u32 2147483647, %v840_v40  ;;  %vm847_vm1 = vweird.f32 %v840_v40 }
 0x4e6   :  { %1222 = vrcp.f32 %v841_v23  ;;  %v868_v3 = vand.u32 2147483648, %v841_v23  ;;  %vm862_vm5 = vweird.f32 %v841_v23  ;;  %v866_v7 = vand.u32 2147483647, %v841_v23 }
 0x4e7   :  { %v854_v44 = vor.u32 1.1754944e-38, %v853_v51  ;;  %vm852_vm3 = vcmp.eq.f32.partialorder %v851_v52, 8.507059e+37 }
 0x4e8   :  { %v869_v19 = vor.u32 1.1754944e-38, %v868_v3  ;;  %vm867_vm7 = vcmp.eq.f32.partialorder %v866_v7, 8.507059e+37 }
 0x4eb   :  { %v1221_v42 = vpop.eup %1220 }
 0x4ec   :  { %v1223_v46 = vpop.eup %1222  ;;  %v843_v33 = vmul.f32 %v1221_v42, %v840_v40  ;;  %vm848_vm0 = vweird.f32 %v1221_v42 }
 0x4ed   :  { %v858_v47 = vmul.f32 %v1223_v46, %v841_v23  ;;  %vm849_vm2 = vmor %vm847_vm1, %vm848_vm0  ;;  %vm863_vm4 = vweird.f32 %v1223_v46 }
 0x4ee   :  { %v844_v50 = vsub.f32 1.0, %v843_v33  ;;  %vm864_vm6 = vmor %vm862_vm5, %vm863_vm4 }
 0x4ef   :  { %v859_v18 = vsub.f32 1.0, %v858_v47 }
 0x4f0   :  { %v845_v26 = vmul.f32 %v1221_v42, %v844_v50 }
 0x4f1   :  { %v860_v35 = vmul.f32 %v1223_v46, %v859_v18 }
 0x4f2   :  { %v846_v54 = vadd.f32 %v1221_v42, %v845_v26 }
 0x4f3   :  { %v861_v56 = vadd.f32 %v1223_v46, %v860_v35 }
 0x4f4   :  { %v850_v53 = vsel %vm849_vm2, %v1221_v42, %v846_v54 }
 0x4f5   :  { %v855_v62 = vsel %vm852_vm3, %v854_v44, %v850_v53  ;;  %v865_v11 = vsel %vm864_vm6, %v1223_v46, %v861_v56 }
 0x4f6   :  { %v873_v13 = vmul.f32 %v872_v55, %v855_v62  ;;  %v870_v22 = vsel %vm867_vm7, %v869_v19, %v865_v11 }
 0x4f7   :  { %v876_v30 = vsub.f32 1.0, %v870_v22  ;;  %v878_v39 = vmul.f32 %v870_v22, %v787_v15 }
 0x4f8   :  { %v874_v10 = vadd.f32 %v873_v13, %v791_v6 }
 0x4fa   :  { %1224 = vtanh.f32 %v874_v10 }
 0x500   :  { %v1225_v31 = vpop.eup %1224 }
 0x501   :  { %v877_v43 = vmul.f32 %v1225_v31, %v876_v30 }
 0x503   :  { %v1695_v41 = vadd.f32 %v878_v39, %v877_v43 }
 0x505   :  { %v884_v48 = vpack.c.bf16 %v1695_v41, %v1695_v41 }
 0x507   :  { %893 = vmatmul.bf16.vlgmr.msrb.gmra.mxu1 %v884_v48  ;;  %906 = vmatmul.bf16.vlgmr.msrb.gmra.mxu2 %v884_v48 }
 0x508   :  { %919 = vmatmul.bf16.vlgmr.msrb.gmra.mxu3 %v884_v48 }
 0x584   :  { %v894_v57 = vpop.f32.mrf.mxu1 }
 0x585   :  { %v924_v58 = vadd.f32 %v894_v57, %v881_v49 }
 0x587   :  { %v1122_v45 = vmul.f32 -1.442695, %v924_v58 }
 0x589   :  { %1226 = vpow2.f32 %v1122_v45 }
 0x58a   :  { %v907_v5 = vpop.f32.mrf.mxu2 }
 0x58b   :  { %v925_v59 = vadd.f32 %v907_v5, %v882_v2  ;;  %v920_v60 = vpop.f32.mrf.mxu3 }
 0x58c   :  { %v896_v61 = vpop.f32.mrf.mxu1  ;;  %v964_v36 = vadd.f32 %v1236_v34, %v920_v60 }
 0x58d   :  { %v1123_v63 = vmul.f32 -1.442695, %v925_v59 }
 0x58f   :  { %v1227_v0 = vpop.eup %1226  ;;  %1228 = vpow2.f32 %v1123_v63 }
 0x590   :  { %v932_v1 = vadd.f32 1.0, %v1227_v0 }
 0x592   :  { %1230 = vrcp.f32 %v932_v1  ;;  %v909_v8 = vpop.f32.mrf.mxu2  ;;  %v945_v20 = vand.u32 2147483648, %v932_v1  ;;  %v943_v24 = vand.u32 2147483647, %v932_v1  ;;  %vm939_vm9 = vweird.f32 %v932_v1 }
 0x593   :  { %v922_v9 = vpop.f32.mrf.mxu3 }
 0x594   :  { %v946_v29 = vor.u32 1.1754944e-38, %v945_v20  ;;  %vm944_vm11 = vcmp.eq.f32.partialorder %v943_v24, 8.507059e+37 }
 0x595   :  { %v1229_v12 = vpop.eup %1228 }
 0x596   :  { %v933_v14 = vadd.f32 1.0, %v1229_v12 }
 0x598   :  { %v1231_v15 = vpop.eup %1230  ;;  %1232 = vrcp.f32 %v933_v14  ;;  %v960_v42 = vand.u32 2147483648, %v933_v14  ;;  %v958_v46 = vand.u32 2147483647, %v933_v14  ;;  %vm954_vm13 = vweird.f32 %v933_v14 }
 0x599   :  { %v935_v16 = vmul.f32 %v1231_v15, %v932_v1  ;;  %vm940_vm8 = vweird.f32 %v1231_v15 }
 0x59a   :  { %vm941_vm10 = vmor %vm939_vm9, %vm940_vm8  ;;  %v961_v51 = vor.u32 1.1754944e-38, %v960_v42  ;;  %vm959_vm15 = vcmp.eq.f32.partialorder %v958_v46, 8.507059e+37 }
 0x59b   :  { %v936_v17 = vsub.f32 1.0, %v935_v16 }
 0x59d   :  { %v937_v21 = vmul.f32 %v1231_v15, %v936_v17 }
 0x59e   :  { %v1233_v4 = vpop.eup %1232 }
 0x59f   :  { %v950_v25 = vmul.f32 %v1233_v4, %v933_v14  ;;  %v938_v27 = vadd.f32 %v1231_v15, %v937_v21  ;;  %vm955_vm12 = vweird.f32 %v1233_v4 }
 0x5a0   :  { %vm956_vm14 = vmor %vm954_vm13, %vm955_vm12 }
 0x5a1   :  { %v951_v28 = vsub.f32 1.0, %v950_v25  ;;  %v942_v32 = vsel %vm941_vm10, %v1231_v15, %v938_v27 }
 0x5a2   :  { %v947_v38 = vsel %vm944_vm11, %v946_v29, %v942_v32 }
 0x5a3   :  { %v965_v40 = vmul.f32 %v964_v36, %v947_v38  ;;  %v952_v23 = vmul.f32 %v1233_v4, %v951_v28 }
 0x5a5   :  { %v966_v33 = vadd.f32 %v965_v40, %v883_v37  ;;  %v953_v47 = vadd.f32 %v1233_v4, %v952_v23 }
 0x5a7   :  { %1234 = vtanh.f32 %v966_v33  ;;  %v957_v50 = vsel %vm956_vm14, %v1233_v4, %v953_v47 }
 0x5a8   :  { %v962_v18 = vsel %vm959_vm15, %v961_v51, %v957_v50 }
 0x5a9   :  { %v968_v26 = vsub.f32 1.0, %v962_v18  ;;  %v970_v54 = vmul.f32 %v962_v18, %v1695_v41 }
 0x5ad   :  { %v1235_v52 = vpop.eup %1234 }
 0x5ae   :  { %v969_v35 = vmul.f32 %v1235_v52, %v968_v26 }
 0x5b0   :  { %v971_v44 = vadd.f32 %v970_v54, %v969_v35 }
 0x5b2   :  { %v976_v55 = vmax.f32 %v971_v44, 0.0  ;;  %972 = vst [vmem:[#allocation9] sm:$0xff] %v971_v44 }
 0x5b3   :  { %999 = dma.vmem_to_hbm [thread:$0]  %s995_s11, 128, %s997_s14, [#allocation10]  }
 0x5b4   :  { %977 = vst [vmem:[#allocation8] sm:$0xff] %v976_v55 }
 0x5b5   :  { %988 = dma.vmem_to_hbm [thread:$0]  %s984_s16, 128, %s986_s19, [#allocation5]  }
 0x5b6   :  { %1363 = dma.done.wait [#allocation5], 128  }
 0x5b7   :  { %1364 = vsyncadd [#allocation5], 4294967168 }
 0x5b8   :  { %1365 = dma.done.wait [#allocation10], 128  }
 0x5b9   :  { %1366 = vsyncadd [#allocation10], 4294967168 }
 0x5ba   :  { %1008 = vsyncpa [#allocation4], 1 }
 0x5bb   :  { %1009 = vsyncpa [#allocation7], 1 }
 0x5bc   :  { %1010 = vsyncpa [#allocation5], 1 }
 0x5bd   :  { %1011 = vsyncpa [#allocation10], 1 }

</bundles_post_ra>
